<compile_context>
chip_gen: v5e
topology: v5e:2x2
jax: 0.10.0
libtpu: 0.0.40
codegen_flags: <defaults>
</compile_context>

<pallas_src>
import functools

import jax
import jax.numpy as jnp
from jax import lax
from jax.experimental import pallas as pl
from jax.experimental.pallas import tpu as pltpu

LANE = 128


def _round_up(x, m):
    return ((x + m - 1) // m) * m


def _vmem_capacity_bytes():
    """Physical VMEM of the local TPU generation (conservative fallback)."""
    try:
        info = pltpu.get_tpu_info()
        cap = getattr(info, "vmem_capacity_bytes", None)
        if cap:
            return int(cap)
    except Exception:
        pass
    return 64 * 1024 * 1024  # v7x per-TensorCore VMEM (safe lower bound)


def _vmem_bytes(th, wo, wp, cin_p, cout_p, K, stride, dilation, itemsize):
    """Consistent VMEM footprint model for one grid step (weights single-buffered)."""
    th_in = (th - 1) * stride + dilation * (K - 1) + 1
    return (K * (K * cin_p) * cout_p * itemsize       # fused per-kh weights (Buffered(1))
            + cout_p * 4                              # fused bias (f32)
            + 2 * th_in * wp * cin_p * itemsize       # double-buffered input halo
            + th_in * wo * K * cin_p * itemsize       # width-im2col scratch
            + 2 * th * wo * cout_p * itemsize         # double-buffered output blocks
            + 2 * th * wo * cout_p * 4                # f32 accumulator + matmul temp
            + th * wo * K * cin_p * itemsize)         # per-kh patch load temp


def _pick_tile_h(H_out, WO, Wp, cin_p, cout_p, stride, dilation, K, itemsize, budget):
    """Largest output-row tile whose working set fits the generation-aware budget."""
    th = H_out
    while th > 1 and _vmem_bytes(th, WO, Wp, cin_p, cout_p, K,
                                 stride, dilation, itemsize) > budget:
        th = max(1, th // 2)
    return th


def _asc_kernel(x_hbm, wtap_ref, bias_ref, o_ref, xbuf, xcat, sem, *,
                K, dilation, stride, TH, TH_in, WO, cin_p):
    """One (batch, row-half, row-tile) of output per grid step.

    x_hbm   : (N, Hp, Wp, cin_p)       padded NHWC input, resident in HBM (pl.ANY)
    wtap_ref: (K, K*cin_p, cout_p)     fused per-kh weights (VMEM, single-buffered)
    bias_ref: (1, cout_p)              fused bias (f32, VMEM, single-buffered)
    o_ref   : (1, TH, WO, cout_p)
    xbuf    : (2, TH_in, Wp, cin_p)    manual double-buffer for the input halo tile
    xcat    : (TH_in, WO, K*cin_p)     width-im2col scratch (lane-aligned groups)
    sem     : DMA semaphores, shape (2,)
    """
    n = pl.program_id(0)
    u = pl.program_id(1)
    r = pl.program_id(2)
    n_inner = pl.num_programs(2)

    slot = r % 2
    tile_rows = TH * stride
    row0 = (u * n_inner + r) * tile_rows      # first padded-input row of this tile

    def tile_copy(start_row, s):
        return pltpu.make_async_copy(
            x_hbm.at[n, pl.ds(start_row, TH_in)],
            xbuf.at[s],
            sem.at[s])

    # Prime this core's chain on the first inner step.
    @pl.when(r == 0)
    def _():
        tile_copy(row0, slot).start()

    # Issue the r+1 prefetch BEFORE waiting on tile r so two DMAs are in flight.
    @pl.when(r + 1 < n_inner)
    def _():
        tile_copy(row0 + tile_rows, 1 - slot).start()

    tile_copy(row0, slot).wait()

    xv = xbuf.at[slot]                        # (TH_in, Wp, cin_p) VMEM view

    # Width im2col: built ONCE per tile.  Group kw holds x[..., w*stride + kw*dilation, :]
    # at a lane offset that is a multiple of 128 (aligned stores); weight rows of the
    # zero-padded channels are zero, so the pad lanes contribute nothing.
    for kw in range(K):
        w0 = kw * dilation
        if stride == 1:
            grp = xv[:, w0:w0 + WO, :]
        else:
            grp = xv[:, pl.ds(w0, WO, stride=stride), :]
        xcat[:, :, kw * cin_p:(kw + 1) * cin_p] = grp

    rows = TH * WO
    cout_p = o_ref.shape[-1]

    # K matmuls with a K*cin_p-deep contraction, accumulated in f32 on the MXU.
    # Per-kh patches are free outer-dim slices; reshapes are layout-preserving
    # because WO is a multiple of the sublane granule.
    acc = jnp.zeros((rows, cout_p), jnp.float32)
    for kh in range(K):
        h0 = kh * dilation
        if stride == 1:
            patch = xcat[h0:h0 + TH, :, :]
        else:
            patch = xcat[pl.ds(h0, TH, stride=stride), :, :]
        acc = acc + jnp.dot(patch.reshape(rows, K * cin_p), wtap_ref[kh],
                            preferred_element_type=jnp.float32)

    acc = acc + bias_ref[...].astype(jnp.float32)
    o_ref[0] = acc.reshape(TH, WO, cout_p).astype(o_ref.dtype)


def atrous_separable_conv(x_nchw, w_dw, b_dw, w_pw, b_pw, *,
                          stride=1, padding=0, dilation=1, tile_h=None):
    """x_nchw: (N, C_in, H, W); w_dw: (C_in, 1, K, K); b_dw: (C_in,)
       w_pw: (C_out, C_in, 1, 1); b_pw: (C_out,).  Returns (N, C_out, H_out, W_out)."""
    N, C_in, H, W = x_nchw.shape
    K = w_dw.shape[-1]
    C_out = w_pw.shape[0]
    x_dtype = x_nchw.dtype
    itemsize = jnp.dtype(x_dtype).itemsize

    H_out = (H + 2 * padding - dilation * (K - 1) - 1) // stride + 1
    W_out = (W + 2 * padding - dilation * (K - 1) - 1) // stride + 1

    # Lane-dense channel padding; output width padded to the sublane granule so
    # in-kernel reshapes are layout-preserving and output stores are unmasked.
    cin_p = _round_up(C_in, LANE)
    cout_p = _round_up(C_out, LANE)
    sub = max(8, 32 // itemsize)
    WO = _round_up(W_out, sub)
    Wp = max(W + 2 * padding, (WO - 1) * stride + dilation * (K - 1) + 1)

    # Generation-aware VMEM budget (~92 MiB on 128-MiB chips, ~46 MiB on v7x).
    vmem_cap = _vmem_capacity_bytes()
    budget = max(24 * 1024 * 1024, min(int(vmem_cap * 0.72), 100 * 1024 * 1024))

    if tile_h is None:
        TH = _pick_tile_h(H_out, WO, Wp, cin_p, cout_p, stride, dilation, K,
                          itemsize, budget)
    else:
        TH = int(tile_h)
    TH = max(1, min(TH, H_out))

    n_row_tiles = -(-H_out // TH)
    # For N == 1, split the row-tile axis so 2-TC chips get both cores while each
    # half keeps its own prefetch chain; on 1-TC chips this only costs one extra
    # self-primed halo DMA per image.
    row_split = 2 if (N == 1 and n_row_tiles >= 2) else 1
    n_inner = -(-n_row_tiles // row_split)
    H_out_p = row_split * n_inner * TH
    TH_in = (TH - 1) * stride + dilation * (K - 1) + 1
    Hp = max(H + 2 * padding, (H_out_p - 1) * stride + dilation * (K - 1) + 1)

    # --- glue: NCHW -> padded, lane-dense NHWC ---
    # TODO(synk): for C_in far below 128 the channel pad inflates HBM traffic; DMA only
    # [..., :C_in] into pre-zeroed xbuf lanes instead if that case matters.
    x_nhwc = jnp.transpose(x_nchw, (0, 2, 3, 1))
    x_pad = jnp.pad(x_nhwc, ((0, 0),
                             (padding, Hp - H - padding),
                             (padding, Wp - W - padding),
                             (0, cin_p - C_in)))

    # --- fold depthwise taps into per-kh pointwise matrices (exact, in f32) ---
    wdw_f = w_dw[:, 0, :, :].astype(jnp.float32)                            # (C_in, K, K)
    wpw_f = jnp.transpose(w_pw[:, :, 0, 0], (1, 0)).astype(jnp.float32)     # (C_in, C_out)
    wtap = (jnp.transpose(wdw_f, (1, 2, 0))[..., None]
            * wpw_f[None, None, :, :])                                      # (K, K, C_in, C_out)
    bias_fused = b_dw.astype(jnp.float32) @ wpw_f + b_pw.astype(jnp.float32)

    wtap_p = jnp.zeros((K, K, cin_p, cout_p), jnp.float32)
    wtap_p = wtap_p.at[:, :, :C_in, :C_out].set(wtap)
    # Row (kw*cin_p + c) of wtap_p[kh] multiplies im2col group kw, channel c.
    # Note: casting the fused product to bf16/fp8 rounds once vs. twice unfused; exact for f32.
    wtap_p = wtap_p.reshape(K, K * cin_p, cout_p).astype(x_dtype)
    bias_p = jnp.zeros((1, cout_p), jnp.float32).at[0, :C_out].set(bias_fused)

    # Raise the scoped VMEM limit only when the tiles actually need it.
    vmem_needed = _vmem_bytes(TH, WO, Wp, cin_p, cout_p, K, stride, dilation, itemsize)
    vmem_limit = None
    if vmem_needed > 12 * 1024 * 1024:
        vmem_limit = min(max(int(vmem_needed * 1.25), 16 * 1024 * 1024),
                         vmem_cap - 8 * 1024 * 1024)

    kernel = functools.partial(
        _asc_kernel, K=K, dilation=dilation, stride=stride,
        TH=TH, TH_in=TH_in, WO=WO, cin_p=cin_p)

    out_full = pl.pallas_call(
        kernel,
        out_shape=jax.ShapeDtypeStruct((N, H_out_p, WO, cout_p), x_dtype),
        grid_spec=pltpu.PrefetchScalarGridSpec(
            num_scalar_prefetch=0,
            grid=(N, row_split, n_inner),
            in_specs=[
                pl.BlockSpec(memory_space=pl.ANY),                      # input stays in HBM
                pl.BlockSpec((K, K * cin_p, cout_p), lambda n, u, r: (0, 0, 0),
                             pipeline_mode=pl.Buffered(1)),             # constant -> single buffer
                pl.BlockSpec((1, cout_p), lambda n, u, r: (0, 0),
                             pipeline_mode=pl.Buffered(1)),
            ],
            out_specs=pl.BlockSpec((1, TH, WO, cout_p),
                                   lambda n, u, r: (n, u * n_inner + r, 0, 0)),
            scratch_shapes=[
                pltpu.VMEM((2, TH_in, Wp, cin_p), x_dtype),
                pltpu.VMEM((TH_in, WO, K * cin_p), x_dtype),
                pltpu.SemaphoreType.DMA((2,)),
            ],
        ),
        compiler_params=pltpu.CompilerParams(
            dimension_semantics=("parallel", "parallel", "arbitrary"),
            vmem_limit_bytes=vmem_limit,
        ),
    )(x_pad, wtap_p, bias_p)

    out = out_full[:, :H_out, :W_out, :C_out]
    # TODO(synk): if the consumer accepts NHWC, return `out` directly and skip this transpose.
    return jnp.transpose(out, (0, 3, 1, 2))


def _reference(x_nchw, w_dw, b_dw, w_pw, b_pw, *, stride, padding, dilation):
    """Pure-JAX reference matching torch.nn.Conv2d semantics."""
    C_in = x_nchw.shape[1]
    y = lax.conv_general_dilated(
        x_nchw, w_dw,
        window_strides=(stride, stride),
        padding=((padding, padding), (padding, padding)),
        rhs_dilation=(dilation, dilation),
        dimension_numbers=('NCHW', 'OIHW', 'NCHW'),
        feature_group_count=C_in)
    y = y + b_dw.reshape(1, -1, 1, 1)
    z = lax.conv_general_dilated(
        y, w_pw, window_strides=(1, 1), padding='VALID',
        dimension_numbers=('NCHW', 'OIHW', 'NCHW'))
    z = z + b_pw.reshape(1, -1, 1, 1)
    return z


if __name__ == "__main__":
    N, C_in, H, W = 2, 4, 16, 16
    C_out, K = 8, 3

    key = jax.random.PRNGKey(0)
    k1, k2, k3, k4, k5 = jax.random.split(key, 5)

    x = jax.random.normal(k1, (N, C_in, H, W), jnp.float32)

    # Deterministic "kaiming_normal_"-style init.
    fan_dw = 1 * K * K
    w_dw = jax.random.normal(k2, (C_in, 1, K, K), jnp.float32) * jnp.sqrt(2.0 / fan_dw)
    b_dw = jax.random.normal(k3, (C_in,), jnp.float32) * 0.1
    fan_pw = C_in
    w_pw = jax.random.normal(k4, (C_out, C_in, 1, 1), jnp.float32) * jnp.sqrt(2.0 / fan_pw)
    b_pw = jax.random.normal(k5, (C_out,), jnp.float32) * 0.1

    configs = [
        # atrous config; small tile_h forces multiple row tiles + a ragged last tile,
        # exercising the halo-DMA prefetch chain and the padded-H_out slicing.
        dict(stride=1, padding=2, dilation=2, tile_h=5),
        # plain 3x3 config with the default (single, auto-sized) tile.
        dict(stride=1, padding=1, dilation=1, tile_h=None),
    ]
    for cfg in configs:
        out = atrous_separable_conv(x, w_dw, b_dw, w_pw, b_pw, **cfg)
        out = jax.block_until_ready(out)
        ref = _reference(x, w_dw, b_dw, w_pw, b_pw,
                         stride=cfg["stride"], padding=cfg["padding"],
                         dilation=cfg["dilation"])
        assert out.shape == ref.shape, (out.shape, ref.shape)
        assert jnp.allclose(out, ref, atol=1e-4, rtol=1e-4), (
            cfg, float(jnp.max(jnp.abs(out - ref))))

    print("KERNEL_OK")
</pallas_src>

<mosaic_0001>
module attributes {stable_mosaic.version = 11 : i64} {
  func.func @_asc_kernel(%arg0: i32, %arg1: i32, %arg2: i32, %arg3: memref<2x24x20x128xf32, #tpu.memory_space<any>>, %arg4: memref<3x384x128xf32, #tpu.memory_space<vmem>>, %arg5: memref<1x128xf32, #tpu.memory_space<vmem>>, %arg6: memref<1x5x16x128xf32, #tpu.memory_space<vmem>>, %arg7: memref<2x9x20x128xf32, #tpu.memory_space<vmem>>, %arg8: memref<9x16x384xf32, #tpu.memory_space<vmem>>, %arg9: memref<2x!tpu.dma_semaphore, #tpu.memory_space<semaphore_mem>>) attributes {dimension_semantics = [#tpu.dimension_semantics<parallel>, #tpu.dimension_semantics<parallel>, #tpu.dimension_semantics<arbitrary>], iteration_bounds = array<i64: 2, 1, 4>, scalar_prefetch = 0 : i64, scratch_operands = 3 : i64, tpu.core_type = #tpu.core_type<tc>, window_params = [{}, {pipeline_mode = #tpu.pipeline_mode<synchronous>, transform_indices = @transform_1, window_bounds = array<i64: 3, 384, 128>}, {pipeline_mode = #tpu.pipeline_mode<synchronous>, transform_indices = @transform_2, window_bounds = array<i64: 1, 128>}, {transform_indices = @transform_3, window_bounds = array<i64: 1, 5, 16, 128>}]} {
    %c2_i32 = arith.constant 2 : i32
    %c0_i32 = arith.constant 0 : i32
    %0 = arith.cmpi eq, %c2_i32, %c0_i32 : i32
    %c1_i32 = arith.constant 1 : i32
    %1 = arith.select %0, %c1_i32, %c2_i32 : i32
    %2 = arith.remsi %arg2, %1 : i32
    %c0_i32_0 = arith.constant 0 : i32
    %3 = arith.cmpi ne, %2, %c0_i32_0 : i32
    %c0_i32_1 = arith.constant 0 : i32
    %4 = arith.cmpi slt, %2, %c0_i32_1 : i32
    %c0_i32_2 = arith.constant 0 : i32
    %5 = arith.cmpi slt, %1, %c0_i32_2 : i32
    %6 = arith.xori %4, %5 : i1
    %7 = arith.andi %6, %3 : i1
    %8 = arith.addi %2, %1 : i32
    %9 = arith.select %7, %8, %2 : i32
    %c4_i32 = arith.constant 4 : i32
    %10 = arith.muli %arg1, %c4_i32 : i32
    %11 = arith.addi %10, %arg2 : i32
    %c5_i32 = arith.constant 5 : i32
    %12 = arith.muli %11, %c5_i32 : i32
    %c0_i32_3 = arith.constant 0 : i32
    %13 = arith.cmpi eq, %arg2, %c0_i32_3 : i32
    %14 = arith.extui %13 : i1 to i32
    %c0_i32_4 = arith.constant 0 : i32
    %15 = arith.cmpi ne, %14, %c0_i32_4 : i32
    scf.if %15 {
      %c0_i32_61 = arith.constant 0 : i32
      %c0_i32_62 = arith.constant 0 : i32
      %64 = tpu.memref_slice %arg3[%arg0, %12, %c0_i32_61, %c0_i32_62] : memref<2x24x20x128xf32, #tpu.memory_space<any>> -> memref<1x9x20x128xf32, #tpu.memory_space<any>>
      %65 = tpu.memref_squeeze %64 : memref<1x9x20x128xf32, #tpu.memory_space<any>> -> memref<9x20x128xf32, #tpu.memory_space<any>>
      %c0_i32_63 = arith.constant 0 : i32
      %c0_i32_64 = arith.constant 0 : i32
      %c0_i32_65 = arith.constant 0 : i32
      %66 = tpu.memref_slice %arg7[%9, %c0_i32_63, %c0_i32_64, %c0_i32_65] : memref<2x9x20x128xf32, #tpu.memory_space<vmem>> -> memref<1x9x20x128xf32, #tpu.memory_space<vmem>>
      %67 = tpu.memref_squeeze %66 : memref<1x9x20x128xf32, #tpu.memory_space<vmem>> -> memref<9x20x128xf32, #tpu.memory_space<vmem>>
      %68 = tpu.memref_slice %arg9[%9] : memref<2x!tpu.dma_semaphore, #tpu.memory_space<semaphore_mem>> -> memref<1x!tpu.dma_semaphore, #tpu.memory_space<semaphore_mem>>
      %69 = tpu.memref_squeeze %68 : memref<1x!tpu.dma_semaphore, #tpu.memory_space<semaphore_mem>> -> memref<!tpu.dma_semaphore, #tpu.memory_space<semaphore_mem>>
      tpu.enqueue_dma source(%65 : memref<9x20x128xf32, #tpu.memory_space<any>>) target(%67 : memref<9x20x128xf32, #tpu.memory_space<vmem>>) target_semaphore(%69 : memref<!tpu.dma_semaphore, #tpu.memory_space<semaphore_mem>>)
    } else {
    }
    %c1_i32_5 = arith.constant 1 : i32
    %16 = arith.addi %arg2, %c1_i32_5 : i32
    %c4_i32_6 = arith.constant 4 : i32
    %17 = arith.cmpi slt, %16, %c4_i32_6 : i32
    %18 = arith.extui %17 : i1 to i32
    %c0_i32_7 = arith.constant 0 : i32
    %19 = arith.cmpi ne, %18, %c0_i32_7 : i32
    scf.if %19 {
      %c5_i32_61 = arith.constant 5 : i32
      %64 = arith.addi %12, %c5_i32_61 : i32
      %c1_i32_62 = arith.constant 1 : i32
      %65 = arith.subi %c1_i32_62, %9 : i32
      %c0_i32_63 = arith.constant 0 : i32
      %c0_i32_64 = arith.constant 0 : i32
      %66 = tpu.memref_slice %arg3[%arg0, %64, %c0_i32_63, %c0_i32_64] : memref<2x24x20x128xf32, #tpu.memory_space<any>> -> memref<1x9x20x128xf32, #tpu.memory_space<any>>
      %67 = tpu.memref_squeeze %66 : memref<1x9x20x128xf32, #tpu.memory_space<any>> -> memref<9x20x128xf32, #tpu.memory_space<any>>
      %c0_i32_65 = arith.constant 0 : i32
      %c0_i32_66 = arith.constant 0 : i32
      %c0_i32_67 = arith.constant 0 : i32
      %68 = tpu.memref_slice %arg7[%65, %c0_i32_65, %c0_i32_66, %c0_i32_67] : memref<2x9x20x128xf32, #tpu.memory_space<vmem>> -> memref<1x9x20x128xf32, #tpu.memory_space<vmem>>
      %69 = tpu.memref_squeeze %68 : memref<1x9x20x128xf32, #tpu.memory_space<vmem>> -> memref<9x20x128xf32, #tpu.memory_space<vmem>>
      %70 = tpu.memref_slice %arg9[%65] : memref<2x!tpu.dma_semaphore, #tpu.memory_space<semaphore_mem>> -> memref<1x!tpu.dma_semaphore, #tpu.memory_space<semaphore_mem>>
      %71 = tpu.memref_squeeze %70 : memref<1x!tpu.dma_semaphore, #tpu.memory_space<semaphore_mem>> -> memref<!tpu.dma_semaphore, #tpu.memory_space<semaphore_mem>>
      tpu.enqueue_dma source(%67 : memref<9x20x128xf32, #tpu.memory_space<any>>) target(%69 : memref<9x20x128xf32, #tpu.memory_space<vmem>>) target_semaphore(%71 : memref<!tpu.dma_semaphore, #tpu.memory_space<semaphore_mem>>)
    } else {
    }
    %c0_i32_8 = arith.constant 0 : i32
    %c0_i32_9 = arith.constant 0 : i32
    %20 = tpu.memref_slice %arg3[%arg0, %12, %c0_i32_8, %c0_i32_9] : memref<2x24x20x128xf32, #tpu.memory_space<any>> -> memref<1x9x20x128xf32, #tpu.memory_space<any>>
    %21 = tpu.memref_squeeze %20 : memref<1x9x20x128xf32, #tpu.memory_space<any>> -> memref<9x20x128xf32, #tpu.memory_space<any>>
    %c0_i32_10 = arith.constant 0 : i32
    %c0_i32_11 = arith.constant 0 : i32
    %c0_i32_12 = arith.constant 0 : i32
    %22 = tpu.memref_slice %arg7[%9, %c0_i32_10, %c0_i32_11, %c0_i32_12] : memref<2x9x20x128xf32, #tpu.memory_space<vmem>> -> memref<1x9x20x128xf32, #tpu.memory_space<vmem>>
    %23 = tpu.memref_squeeze %22 : memref<1x9x20x128xf32, #tpu.memory_space<vmem>> -> memref<9x20x128xf32, #tpu.memory_space<vmem>>
    %24 = tpu.memref_slice %arg9[%9] : memref<2x!tpu.dma_semaphore, #tpu.memory_space<semaphore_mem>> -> memref<1x!tpu.dma_semaphore, #tpu.memory_space<semaphore_mem>>
    %25 = tpu.memref_squeeze %24 : memref<1x!tpu.dma_semaphore, #tpu.memory_space<semaphore_mem>> -> memref<!tpu.dma_semaphore, #tpu.memory_space<semaphore_mem>>
    tpu.wait_dma2 semaphore(%25 : memref<!tpu.dma_semaphore, #tpu.memory_space<semaphore_mem>>) src(%21 : memref<9x20x128xf32, #tpu.memory_space<any>>) dst(%23 : memref<9x20x128xf32, #tpu.memory_space<vmem>>)
    %c0_i32_13 = arith.constant 0 : i32
    %c0_i32_14 = arith.constant 0 : i32
    %c0_i32_15 = arith.constant 0 : i32
    %26 = tpu.memref_slice %arg7[%9, %c0_i32_13, %c0_i32_14, %c0_i32_15] : memref<2x9x20x128xf32, #tpu.memory_space<vmem>> -> memref<1x9x20x128xf32, #tpu.memory_space<vmem>>
    %27 = tpu.memref_squeeze %26 : memref<1x9x20x128xf32, #tpu.memory_space<vmem>> -> memref<9x20x128xf32, #tpu.memory_space<vmem>>
    %c0 = arith.constant 0 : index
    %c0_16 = arith.constant 0 : index
    %c0_17 = arith.constant 0 : index
    %28 = vector.load %27[%c0, %c0_16, %c0_17] : memref<9x20x128xf32, #tpu.memory_space<vmem>>, vector<9x16x128xf32>
    %c0_18 = arith.constant 0 : index
    %c0_19 = arith.constant 0 : index
    %c0_20 = arith.constant 0 : index
    %29 = vector.load %arg8[%c0_18, %c0_19, %c0_20] : memref<9x16x384xf32, #tpu.memory_space<vmem>>, vector<9x16x128xf32>
    tpu.vector_store %arg8[%c0_18, %c0_19, %c0_20], %28 {strides = array<i32>} : memref<9x16x384xf32, #tpu.memory_space<vmem>>, vector<9x16x128xf32>,
    %c0_i32_21 = arith.constant 0 : i32
    %c0_i32_22 = arith.constant 0 : i32
    %c0_i32_23 = arith.constant 0 : i32
    %30 = tpu.memref_slice %arg7[%9, %c0_i32_21, %c0_i32_22, %c0_i32_23] : memref<2x9x20x128xf32, #tpu.memory_space<vmem>> -> memref<1x9x20x128xf32, #tpu.memory_space<vmem>>
    %31 = tpu.memref_squeeze %30 : memref<1x9x20x128xf32, #tpu.memory_space<vmem>> -> memref<9x20x128xf32, #tpu.memory_space<vmem>>
    %c0_24 = arith.constant 0 : index
    %c2 = arith.constant 2 : index
    %c0_25 = arith.constant 0 : index
    %32 = vector.load %31[%c0_24, %c2, %c0_25] : memref<9x20x128xf32, #tpu.memory_space<vmem>>, vector<9x16x128xf32>
    %c0_26 = arith.constant 0 : index
    %c0_27 = arith.constant 0 : index
    %c128 = arith.constant 128 : index
    %33 = vector.load %arg8[%c0_26, %c0_27, %c128] : memref<9x16x384xf32, #tpu.memory_space<vmem>>, vector<9x16x128xf32>
    tpu.vector_store %arg8[%c0_26, %c0_27, %c128], %32 {strides = array<i32>} : memref<9x16x384xf32, #tpu.memory_space<vmem>>, vector<9x16x128xf32>,
    %c0_i32_28 = arith.constant 0 : i32
    %c0_i32_29 = arith.constant 0 : i32
    %c0_i32_30 = arith.constant 0 : i32
    %34 = tpu.memref_slice %arg7[%9, %c0_i32_28, %c0_i32_29, %c0_i32_30] : memref<2x9x20x128xf32, #tpu.memory_space<vmem>> -> memref<1x9x20x128xf32, #tpu.memory_space<vmem>>
    %35 = tpu.memref_squeeze %34 : memref<1x9x20x128xf32, #tpu.memory_space<vmem>> -> memref<9x20x128xf32, #tpu.memory_space<vmem>>
    %c0_31 = arith.constant 0 : index
    %c4 = arith.constant 4 : index
    %c0_32 = arith.constant 0 : index
    %36 = vector.load %35[%c0_31, %c4, %c0_32] : memref<9x20x128xf32, #tpu.memory_space<vmem>>, vector<9x16x128xf32>
    %c0_33 = arith.constant 0 : index
    %c0_34 = arith.constant 0 : index
    %c256 = arith.constant 256 : index
    %37 = vector.load %arg8[%c0_33, %c0_34, %c256] : memref<9x16x384xf32, #tpu.memory_space<vmem>>, vector<9x16x128xf32>
    tpu.vector_store %arg8[%c0_33, %c0_34, %c256], %36 {strides = array<i32>} : memref<9x16x384xf32, #tpu.memory_space<vmem>>, vector<9x16x128xf32>,
    %cst = arith.constant 0.000000e+00 : f32
    %38 = vector.broadcast %cst : f32 to vector<80x128xf32>
    %c0_35 = arith.constant 0 : index
    %c0_36 = arith.constant 0 : index
    %c0_37 = arith.constant 0 : index
    %39 = vector.load %arg8[%c0_35, %c0_36, %c0_37] : memref<9x16x384xf32, #tpu.memory_space<vmem>>, vector<5x16x384xf32>
    %40 = vector.shape_cast %39 : vector<5x16x384xf32> to vector<80x384xf32>
    %c0_38 = arith.constant 0 : index
    %c0_39 = arith.constant 0 : index
    %c0_40 = arith.constant 0 : index
    %41 = vector.load %arg4[%c0_38, %c0_39, %c0_40] : memref<3x384x128xf32, #tpu.memory_space<vmem>>, vector<1x384x128xf32>
    %42 = vector.shape_cast %41 : vector<1x384x128xf32> to vector<384x128xf32>
    %cst_41 = arith.constant dense<0.000000e+00> : vector<80x128xf32>
    %43 = tpu.matmul %40, %42, %cst_41 {dimension_numbers = #tpu.dot_dimension_numbers<[1], [0], [0], [1], [0, 0, 1, 1], [], []>} : vector<80x384xf32>, vector<384x128xf32>, vector<80x128xf32> -> vector<80x128xf32>
    %44 = arith.addf %38, %43 : vector<80x128xf32>
    %c2_42 = arith.constant 2 : index
    %c0_43 = arith.constant 0 : index
    %c0_44 = arith.constant 0 : index
    %45 = vector.load %arg8[%c2_42, %c0_43, %c0_44] : memref<9x16x384xf32, #tpu.memory_space<vmem>>, vector<5x16x384xf32>
    %46 = vector.shape_cast %45 : vector<5x16x384xf32> to vector<80x384xf32>
    %c1 = arith.constant 1 : index
    %c0_45 = arith.constant 0 : index
    %c0_46 = arith.constant 0 : index
    %47 = vector.load %arg4[%c1, %c0_45, %c0_46] : memref<3x384x128xf32, #tpu.memory_space<vmem>>, vector<1x384x128xf32>
    %48 = vector.shape_cast %47 : vector<1x384x128xf32> to vector<384x128xf32>
    %cst_47 = arith.constant dense<0.000000e+00> : vector<80x128xf32>
    %49 = tpu.matmul %46, %48, %cst_47 {dimension_numbers = #tpu.dot_dimension_numbers<[1], [0], [0], [1], [0, 0, 1, 1], [], []>} : vector<80x384xf32>, vector<384x128xf32>, vector<80x128xf32> -> vector<80x128xf32>
    %50 = arith.addf %44, %49 : vector<80x128xf32>
    %c4_48 = arith.constant 4 : index
    %c0_49 = arith.constant 0 : index
    %c0_50 = arith.constant 0 : index
    %51 = vector.load %arg8[%c4_48, %c0_49, %c0_50] : memref<9x16x384xf32, #tpu.memory_space<vmem>>, vector<5x16x384xf32>
    %52 = vector.shape_cast %51 : vector<5x16x384xf32> to vector<80x384xf32>
    %c2_51 = arith.constant 2 : index
    %c0_52 = arith.constant 0 : index
    %c0_53 = arith.constant 0 : index
    %53 = vector.load %arg4[%c2_51, %c0_52, %c0_53] : memref<3x384x128xf32, #tpu.memory_space<vmem>>, vector<1x384x128xf32>
    %54 = vector.shape_cast %53 : vector<1x384x128xf32> to vector<384x128xf32>
    %cst_54 = arith.constant dense<0.000000e+00> : vector<80x128xf32>
    %55 = tpu.matmul %52, %54, %cst_54 {dimension_numbers = #tpu.dot_dimension_numbers<[1], [0], [0], [1], [0, 0, 1, 1], [], []>} : vector<80x384xf32>, vector<384x128xf32>, vector<80x128xf32> -> vector<80x128xf32>
    %56 = arith.addf %50, %55 : vector<80x128xf32>
    %c0_55 = arith.constant 0 : index
    %c0_56 = arith.constant 0 : index
    %57 = vector.load %arg5[%c0_55, %c0_56] : memref<1x128xf32, #tpu.memory_space<vmem>>, vector<1x128xf32>
    %58 = vector.broadcast %57 : vector<1x128xf32> to vector<80x128xf32>
    %59 = arith.addf %56, %58 : vector<80x128xf32>
    %60 = vector.shape_cast %59 : vector<80x128xf32> to vector<5x16x128xf32>
    %c0_57 = arith.constant 0 : index
    %c0_58 = arith.constant 0 : index
    %c0_59 = arith.constant 0 : index
    %c0_60 = arith.constant 0 : index
    %61 = vector.load %arg6[%c0_57, %c0_58, %c0_59, %c0_60] : memref<1x5x16x128xf32, #tpu.memory_space<vmem>>, vector<1x5x16x128xf32>
    %62 = vector.shape_cast %61 : vector<1x5x16x128xf32> to vector<5x16x128xf32>
    %63 = vector.shape_cast %60 : vector<5x16x128xf32> to vector<1x5x16x128xf32>
    tpu.vector_store %arg6[%c0_57, %c0_58, %c0_59, %c0_60], %63 {strides = array<i32>} : memref<1x5x16x128xf32, #tpu.memory_space<vmem>>, vector<1x5x16x128xf32>,
    return
  }
  func.func @transform_1(%arg0: i32, %arg1: i32, %arg2: i32) -> (i32, i32, i32) {
    %c0_i32 = arith.constant 0 : i32
    %c0_i32_0 = arith.constant 0 : i32
    %c0_i32_1 = arith.constant 0 : i32
    %c0_i32_2 = arith.constant 0 : i32
    return %c0_i32, %c0_i32_0, %c0_i32_1 : i32, i32, i32
  }
  func.func @transform_2(%arg0: i32, %arg1: i32, %arg2: i32) -> (i32, i32) {
    %c0_i32 = arith.constant 0 : i32
    %c0_i32_0 = arith.constant 0 : i32
    %c0_i32_1 = arith.constant 0 : i32
    return %c0_i32, %c0_i32_0 : i32, i32
  }
  func.func @transform_3(%arg0: i32, %arg1: i32, %arg2: i32) -> (i32, i32, i32, i32) {
    %c4_i32 = arith.constant 4 : i32
    %0 = arith.muli %arg1, %c4_i32 : i32
    %1 = arith.addi %0, %arg2 : i32
    %c0_i32 = arith.constant 0 : i32
    %c0_i32_0 = arith.constant 0 : i32
    %c0_i32_1 = arith.constant 0 : i32
    return %arg0, %1, %c0_i32, %c0_i32_0 : i32, i32, i32, i32
  }
}

</mosaic_0001>

<bundles_post_ra>
// kernel: tpu_custom_call.1
= control target key start
LH: loop header
LB: loop body
LE: loop exit
PB: predicated region body
PF: predicated region fallthrough
CT: control target
= control target key end

     0   :  { %8 = vsyncpa [#allocation6], 0  ;;  %s2679_s0 = inlined_call_operand.vmem [shape: f32[2,24,20,128], index: 0, kind: input, shape index: {}]   ;;  %s2680_s1 = inlined_call_operand.vmem [shape: f32[3,384,128], index: 1, kind: input, shape index: {}]   ;;  %s2681_s2 = inlined_call_operand.vmem [shape: f32[1,128], index: 2, kind: input, shape index: {}]   ;;  %s2682_s3 = inlined_call_operand.hbm [shape: f32[2,20,16,128], index: 3, kind: output, shape index: {}]  }
   0x1   :  { %10 = vsyncpa [#allocation6 + $0x1], 0  ;;  %s1716_s12 = smov 0   ;;  %s1718_s13 = smov 0  }
   0x2   :  { %s1720_s14 = smov 0   ;;  %s1722_s15 = smov 0  }
   0x3   :  { %s1724_s16 = smov 0   ;;  %s1726_s17 = smov 0  }
   0x4   :  { %s1728_s18 = smov 0   ;;  %s1730_s19 = smov 0  }
   0x5 LB: > { %s1304_s20 = sadd.s32 4294967295, %s1692_s19   ;;  %s1305_s21 = sadd.s32 4294967294, %s1692_s19   ;;  %s1692_s19 = sphi %s1730_s19, %s16_s19   ;;  %s1688_s18 = sphi %s1728_s18, %s2691_s18   ;;  %s1684_s17 = sphi %s1726_s17, %s2690_s17   ;;  %s1680_s16 = sphi %s1724_s16, %s2689_s16   ;;  %s1676_s15 = sphi %s1722_s15, %s2688_s15   ;;  %s1672_s14 = sphi %s1720_s14, %s2687_s14   ;;  %s1668_s13 = sphi %s1718_s13, %s2686_s13   ;;  %s1664_s12 = sphi %s1716_s12, %s2685_s12  }
   0x6   : > { %s28_s22 = sadd.s32 1, %s1684_s17  ;;  %s35_s23 = sadd.s32 1, %s1688_s18 }
   0x7   : > { %p29_p0 = scmp.ge.s32.totalorder %s28_s22, 4  ;;  %p100_p1 = scmp.ne.s32.totalorder %s1672_s14, %s1668_s13 }
   0x8   : > { %p101_p2 = scmp.eq.s32.totalorder %s1304_s20, 7  ;;  %p106_p5 = scmp.ne.s32.totalorder %s1668_s13, %s1664_s12 }
   0x9   : > { %s2693_s22 = smov (%p29_p0, %s28_s22), 0  ;;  %s2695_s23 = smov (!%p29_p0, %s35_s23), %s1688_s18 }
   0xa   : > { %s86_s24 = ssub.s32 %s1684_s17, %s2693_s22  ;;  %p1767_p3 = por %p101_p2, %p100_p1 }
   0xb   : > { %p37_p4 = scmp.ge.s32.totalorder %s2695_s23, 2  ;;  %p107_p6 = scmp.eq.s32.totalorder %s1305_s21, 7 }
   0xc   : > { %p1307_p7 = scmp.ge.s32.totalorder %s1692_s19, 1  ;;  %p131_p9 = scmp.lt.s32.totalorder %s1692_s19, 9 }
   0xd   : > { %s2697_s23 = smov (%p37_p4, %s2695_s23), 0  ;;  %p1776_p8 = por %p107_p6, %p106_p5 }
   0xe   : > { %s85_s27 = ssub.s32 %s1688_s18, %s2697_s23  ;;  %s90_s28 = sadd.s32 1, %s1672_s14 }
   0xf   : > { %s87_s29 = sor.u32 %s86_s24, %s85_s27  ;;  %p132_p10 = pnand %p1307_p7, %p131_p9 }
  0x10   : > { %p88_p11 = scmp.eq.s32.totalorder %s87_s29, 0  ;;  %s145_s4 = sand.u32 (!%p132_p10), 1, %s1668_s13  }
  0x11   : > { %135 = sbr.rel (%p132_p10) target bundleno = 459 (0x1cb), region = 28  ;;  %p151_p12 = scmp.lt.s32.totalorder (!%p132_p10), %s1676_s15, 0 }
  0x12   : > { %s1785_s30 = scalar_select %p88_p11, %s1672_s14, %s90_s28  }
  0x13   : > { %s1520_s5 = smul.u32 (!%p132_p10), 80, %s145_s4  ;;  %s152_s6 = ssub.s32 (!%p132_p10), 0, %s1676_s15 }
  0x14   : > { %s1308_s7 = smin.u32 (!%p132_p10), %s1676_s15, %s152_s6  ;;  %p1311_p0 = scmp.ne.s32.totalorder (!%p132_p10), %s1676_s15, 0 }
  0x15   : > { %s154_s8 = sand.u32 (!%p132_p10), 1, %s1308_s7   ;;  %s1795_s11 = scalar_lea.vmem (!%p132_p10), [#allocation5], %s1520_s5 }
  0x16   : > { %s155_s9 = ssub.s32 0, %s154_s8  ;;  %169 = sbr.rel (%p1311_p0) target bundleno = 58 (0x3a), region = 32 }
  0x17   : > { %s2699_s9 = smov (!%p151_p12, %s155_s9), %s154_s8  ;;  %s1312_s20 = smul.u32 (!%p1311_p0), 120, %s1676_s15 }
  0x18   : > { %p1310_p13 = scmp.lt.s32.totalorder %s2699_s9, 0  ;;  %s161_s10 = sadd.s32 2, %s2699_s9 }
  0x19   : > { %s171_s21 = smul.u32 (!%p1311_p0), 576, %s1680_s16 }
  0x1a   : > { %s2701_s10 = smov (!%p1310_p13, %s161_s10), %s2699_s9 }
  0x1b   : > { %s174_s24 = smul.u32 216, %s2701_s10  ;;  %s172_s27 = sadd.s32 %s1312_s20, %s171_s21 }
  0x1c   : > { %s1804_s6 = scalar_lea.vmem %s2679_s0, %s172_s27  ;;  %s176_s7 = scalar_lea.sflag [#allocation4], %s2701_s10 }
  0x1d   : > { %v189_v0 = vld [vmem:[%s1804_s6] sm:$0xff]  ;;  %v191_v1 = vld [vmem:[%s1804_s6 + $0x8] sm:$0xff]  ;;  %v193_v2 = vld [vmem:[%s1804_s6 + $0x18] sm:$0xff]  ;;  %s1809_s5 = scalar_lea.vmem [#allocation2], %s174_s24 }
  0x1e   : > { %190 = vst [vmem:[%s1809_s5] sm:$0xff] %v189_v0  ;;  %v195_v3 = vld [vmem:[%s1804_s6 + $0x20] sm:$0xff]  ;;  %v197_v4 = vld [vmem:[%s1804_s6 + $0x30] sm:$0xff]  ;;  %v199_v5 = vld [vmem:[%s1804_s6 + $0x38] sm:$0xff] }
  0x1f   : > { %192 = vst [vmem:[%s1809_s5 + $0x8] sm:$0xff] %v191_v1  ;;  %v201_v6 = vld [vmem:[%s1804_s6 + $0x48] sm:$0xff]  ;;  %v203_v7 = vld [vmem:[%s1804_s6 + $0x50] sm:$0xff]  ;;  %v205_v8 = vld [vmem:[%s1804_s6 + $0x60] sm:$0xff] }
  0x20   : > { %194 = vst [vmem:[%s1809_s5 + $0x18] sm:$0xff] %v193_v2  ;;  %v207_v9 = vld [vmem:[%s1804_s6 + $0x68] sm:$0xff]  ;;  %v209_v10 = vld [vmem:[%s1804_s6 + $0x78] sm:$0xff]  ;;  %v211_v11 = vld [vmem:[%s1804_s6 + $0x80] sm:$0xff] }
  0x21   : > { %196 = vst [vmem:[%s1809_s5 + $0x20] sm:$0xff] %v195_v3  ;;  %v213_v12 = vld [vmem:[%s1804_s6 + $0x90] sm:$0xff]  ;;  %v215_v13 = vld [vmem:[%s1804_s6 + $0x98] sm:$0xff]  ;;  %v217_v14 = vld [vmem:[%s1804_s6 + $0xa8] sm:$0xff] }
  0x22   : > { %198 = vst [vmem:[%s1809_s5 + $0x30] sm:$0xff] %v197_v4  ;;  %v219_v15 = vld [vmem:[%s1804_s6 + $0xb0] sm:$0xff]  ;;  %v221_v16 = vld [vmem:[%s1804_s6 + $0xc0] sm:$0xff]  ;;  %v223_v17 = vld [vmem:[%s1804_s6 + $0xc8] sm:$0xff] }
  0x23   : > { %200 = vst [vmem:[%s1809_s5 + $0x38] sm:$0xff] %v199_v5  ;;  %v1313_v18 = vld [vmem:[%s1804_s6 + $0x10] sm:$0xf]  ;;  %v1315_v19 = vld [vmem:[%s1804_s6 + $0x28] sm:$0xf] }
  0x24   : > { %202 = vst [vmem:[%s1809_s5 + $0x48] sm:$0xff] %v201_v6  ;;  %v1317_v20 = vld [vmem:[%s1804_s6 + $0x40] sm:$0xf]  ;;  %v1319_v21 = vld [vmem:[%s1804_s6 + $0x58] sm:$0xf] }
  0x25   : > { %204 = vst [vmem:[%s1809_s5 + $0x50] sm:$0xff] %v203_v7  ;;  %v1321_v22 = vld [vmem:[%s1804_s6 + $0x70] sm:$0xf]  ;;  %v1323_v23 = vld [vmem:[%s1804_s6 + $0x88] sm:$0xf] }
  0x26   : > { %206 = vst [vmem:[%s1809_s5 + $0x60] sm:$0xff] %v205_v8  ;;  %v1325_v24 = vld [vmem:[%s1804_s6 + $0xa0] sm:$0xf]  ;;  %v1327_v25 = vld [vmem:[%s1804_s6 + $0xb8] sm:$0xf] }
  0x27   : > { %208 = vst [vmem:[%s1809_s5 + $0x68] sm:$0xff] %v207_v9  ;;  %v1329_v26 = vld [vmem:[%s1804_s6 + $0xd0] sm:$0xf] }
  0x28   : > { %210 = vst [vmem:[%s1809_s5 + $0x78] sm:$0xff] %v209_v10 }
  0x29   : > { %212 = vst [vmem:[%s1809_s5 + $0x80] sm:$0xff] %v211_v11 }
  0x2a   : > { %214 = vst [vmem:[%s1809_s5 + $0x90] sm:$0xff] %v213_v12 }
  0x2b   : > { %216 = vst [vmem:[%s1809_s5 + $0x98] sm:$0xff] %v215_v13 }
  0x2c   : > { %218 = vst [vmem:[%s1809_s5 + $0xa8] sm:$0xff] %v217_v14 }
  0x2d   : > { %220 = vst [vmem:[%s1809_s5 + $0xb0] sm:$0xff] %v219_v15 }
  0x2e   : > { %222 = vst [vmem:[%s1809_s5 + $0xc0] sm:$0xff] %v221_v16 }
  0x2f   : > { %224 = vst [vmem:[%s1809_s5 + $0xc8] sm:$0xff] %v223_v17 }
  0x30   : > { %1314 = vst [vmem:[%s1809_s5 + $0x10] sm:$0xf] %v1313_v18 }
  0x31   : > { %1316 = vst [vmem:[%s1809_s5 + $0x28] sm:$0xf] %v1315_v19 }
  0x32   : > { %1318 = vst [vmem:[%s1809_s5 + $0x40] sm:$0xf] %v1317_v20 }
  0x33   : > { %1320 = vst [vmem:[%s1809_s5 + $0x58] sm:$0xf] %v1319_v21 }
  0x34   : > { %1322 = vst [vmem:[%s1809_s5 + $0x70] sm:$0xf] %v1321_v22 }
  0x35   : > { %1324 = vst [vmem:[%s1809_s5 + $0x88] sm:$0xf] %v1323_v23 }
  0x36   : > { %1326 = vst [vmem:[%s1809_s5 + $0xa0] sm:$0xf] %v1325_v24 }
  0x37   : > { %1328 = vst [vmem:[%s1809_s5 + $0xb8] sm:$0xf] %v1327_v25 }
  0x38   : > { %1330 = vst [vmem:[%s1809_s5 + $0xd0] sm:$0xf] %v1329_v26 }
  0x39   : > { %256 = vsyncadd %s176_s7, 2880 }
  0x3a PF: > { %s257_s8 = sadd.s32 1, %s1676_s15 }
  0x3b   : > { %p1331_p1 = scmp.ge.s32.totalorder %s257_s8, 4 }
  0x3c   : > { %s263_s9 = ssub.s32 (!%p1331_p1), 1, %s2701_s10  ;;  %s1332_s20 = smul.u32 (!%p1331_p1), 120, %s1676_s15 }
  0x3d   : > { %261 = sbr.rel (%p1331_p1) target bundleno = 95 (0x5f), region = 58  ;;  %s270_s7 = scalar_lea.sflag (!%p1331_p1), [#allocation4], %s263_s9 }
  0x3e   : > { %s1235_s21 = smul.u32 (!%p1331_p1), 576, %s1680_s16 }
  0x3f   : > { %s268_s24 = smul.u32 (!%p1331_p1), 216, %s263_s9 }
  0x40   : > { %s1236_s27 = sadd.s32 (!%p1331_p1), %s1332_s20, %s1235_s21 }
  0x41   : > { %s1872_s6 = scalar_lea.vmem (!%p1331_p1), %s2679_s0, %s1236_s27  ;;  %s1877_s5 = scalar_lea.vmem (!%p1331_p1), [#allocation2], %s268_s24 }
  0x42   : > { %v1333_v27 = vld [vmem:[%s1872_s6 + $0x78] sm:$0xff]  ;;  %v1334_v28 = vld [vmem:[%s1872_s6 + $0x80] sm:$0xff]  ;;  %v1335_v29 = vld [vmem:[%s1872_s6 + $0x90] sm:$0xff] }
  0x43   : > { %284 = vst [vmem:[%s1877_s5] sm:$0xff] %v1333_v27  ;;  %v1336_v30 = vld [vmem:[%s1872_s6 + $0x98] sm:$0xff]  ;;  %v1337_v31 = vld [vmem:[%s1872_s6 + $0xa8] sm:$0xff]  ;;  %v1338_v32 = vld [vmem:[%s1872_s6 + $0xb0] sm:$0xff] }
  0x44   : > { %286 = vst [vmem:[%s1877_s5 + $0x8] sm:$0xff] %v1334_v28  ;;  %v1339_v33 = vld [vmem:[%s1872_s6 + $0xc0] sm:$0xff]  ;;  %v1340_v34 = vld [vmem:[%s1872_s6 + $0xc8] sm:$0xff]  ;;  %v1341_v35 = vld [vmem:[%s1872_s6 + $0xd8] sm:$0xff] }
  0x45   : > { %288 = vst [vmem:[%s1877_s5 + $0x18] sm:$0xff] %v1335_v29  ;;  %v1342_v36 = vld [vmem:[%s1872_s6 + $0xe0] sm:$0xff]  ;;  %v1343_v37 = vld [vmem:[%s1872_s6 + $0xf0] sm:$0xff]  ;;  %v1344_v38 = vld [vmem:[%s1872_s6 + $0xf8] sm:$0xff] }
  0x46   : > { %290 = vst [vmem:[%s1877_s5 + $0x20] sm:$0xff] %v1336_v30  ;;  %v1345_v39 = vld [vmem:[%s1872_s6 + $0x108] sm:$0xff]  ;;  %v1346_v40 = vld [vmem:[%s1872_s6 + $0x110] sm:$0xff]  ;;  %v1347_v41 = vld [vmem:[%s1872_s6 + $0x120] sm:$0xff] }
  0x47   : > { %292 = vst [vmem:[%s1877_s5 + $0x30] sm:$0xff] %v1337_v31  ;;  %v1348_v42 = vld [vmem:[%s1872_s6 + $0x128] sm:$0xff]  ;;  %v1349_v43 = vld [vmem:[%s1872_s6 + $0x138] sm:$0xff]  ;;  %v1350_v44 = vld [vmem:[%s1872_s6 + $0x140] sm:$0xff] }
  0x48   : > { %294 = vst [vmem:[%s1877_s5 + $0x38] sm:$0xff] %v1338_v32  ;;  %v1351_v45 = vld [vmem:[%s1872_s6 + $0x88] sm:$0xf]  ;;  %v1353_v46 = vld [vmem:[%s1872_s6 + $0xa0] sm:$0xf] }
  0x49   : > { %296 = vst [vmem:[%s1877_s5 + $0x48] sm:$0xff] %v1339_v33  ;;  %v1355_v47 = vld [vmem:[%s1872_s6 + $0xb8] sm:$0xf]  ;;  %v1357_v48 = vld [vmem:[%s1872_s6 + $0xd0] sm:$0xf] }
  0x4a   : > { %298 = vst [vmem:[%s1877_s5 + $0x50] sm:$0xff] %v1340_v34  ;;  %v1359_v49 = vld [vmem:[%s1872_s6 + $0xe8] sm:$0xf]  ;;  %v1361_v50 = vld [vmem:[%s1872_s6 + $0x100] sm:$0xf] }
  0x4b   : > { %300 = vst [vmem:[%s1877_s5 + $0x60] sm:$0xff] %v1341_v35  ;;  %v1363_v51 = vld [vmem:[%s1872_s6 + $0x118] sm:$0xf]  ;;  %v1365_v52 = vld [vmem:[%s1872_s6 + $0x130] sm:$0xf] }
  0x4c   : > { %302 = vst [vmem:[%s1877_s5 + $0x68] sm:$0xff] %v1342_v36  ;;  %v1367_v53 = vld [vmem:[%s1872_s6 + $0x148] sm:$0xf] }
  0x4d   : > { %304 = vst [vmem:[%s1877_s5 + $0x78] sm:$0xff] %v1343_v37 }
  0x4e   : > { %306 = vst [vmem:[%s1877_s5 + $0x80] sm:$0xff] %v1344_v38 }
  0x4f   : > { %308 = vst [vmem:[%s1877_s5 + $0x90] sm:$0xff] %v1345_v39 }
  0x50   : > { %310 = vst [vmem:[%s1877_s5 + $0x98] sm:$0xff] %v1346_v40 }
  0x51   : > { %312 = vst [vmem:[%s1877_s5 + $0xa8] sm:$0xff] %v1347_v41 }
  0x52   : > { %314 = vst [vmem:[%s1877_s5 + $0xb0] sm:$0xff] %v1348_v42 }
  0x53   : > { %316 = vst [vmem:[%s1877_s5 + $0xc0] sm:$0xff] %v1349_v43 }
  0x54   : > { %318 = vst [vmem:[%s1877_s5 + $0xc8] sm:$0xff] %v1350_v44 }
  0x55   : > { %1352 = vst [vmem:[%s1877_s5 + $0x10] sm:$0xf] %v1351_v45 }
  0x56   : > { %1354 = vst [vmem:[%s1877_s5 + $0x28] sm:$0xf] %v1353_v46 }
  0x57   : > { %1356 = vst [vmem:[%s1877_s5 + $0x40] sm:$0xf] %v1355_v47 }
  0x58   : > { %1358 = vst [vmem:[%s1877_s5 + $0x58] sm:$0xf] %v1357_v48 }
  0x59   : > { %1360 = vst [vmem:[%s1877_s5 + $0x70] sm:$0xf] %v1359_v49 }
  0x5a   : > { %1362 = vst [vmem:[%s1877_s5 + $0x88] sm:$0xf] %v1361_v50 }
  0x5b   : > { %1364 = vst [vmem:[%s1877_s5 + $0xa0] sm:$0xf] %v1363_v51 }
  0x5c   : > { %1366 = vst [vmem:[%s1877_s5 + $0xb8] sm:$0xf] %v1365_v52 }
  0x5d   : > { %1368 = vst [vmem:[%s1877_s5 + $0xd0] sm:$0xf] %v1367_v53 }
  0x5e   : > { %350 = vsyncadd %s270_s7, 2880 }
  0x5f PF: > { %s351_s8 = smul.u32 216, %s2701_s10  ;;  %s353_s21 = scalar_lea.sflag [#allocation4], %s2701_s10 }
  0x61   : > { %s1933_s20 = scalar_lea.vmem [#allocation2], %s351_s8 }
  0x62   : > { %1656 = dma.done.wait %s353_s21, 2880 }
  0x63   : > { %1657 = vsyncadd %s353_s21, 4294964416  ;;  %v1384_v54 = vld [vmem:[%s2680_s1 + $0x1f8] sm:$0xff]  ;;  %v1383_v55 = vld [vmem:[%s2680_s1 + $0x1f0] sm:$0xff]  ;;  %s1471_s29 = smul.u32 10, %s1676_s15  ;;  %s1179_s7 = sshll.u32 %s1795_s11, 4  ;;  %s1180_s7 = int_to_ptr.vmem [resolvable:$true] %s1179_s7 }
  0x64   : > { %1472 = vmatpush.msra.mxu1 %v1384_v54  ;;  %1473 = vmatpush.msra.mxu2 %v1384_v54  ;;  %v1382_v56 = vld [vmem:[%s2680_s1 + $0x1e8] sm:$0xff]  ;;  %v1381_v57 = vld [vmem:[%s2680_s1 + $0x1e0] sm:$0xff]  ;;  %v511_v58 = vld [vmem:[%s2680_s1 + $0x78] sm:$0xff]  ;;  %s1521_s9 = smul.u32 40, %s1680_s16  ;;  %s1162_s21 = scalar_lea.sflag [#allocation6], %s145_s4 }
  0x65   : > { %624 = vmatpush.msra.mxu0 %v1384_v54  ;;  %v510_v59 = vld [vmem:[%s2680_s1 + $0x70] sm:$0xff]  ;;  %v1380_v60 = vld [vmem:[%s2680_s1 + $0x1d8] sm:$0xff]  ;;  %765 = vmatpush.msra.mxu3 %v511_v58  ;;  %v509_v61 = vld [vmem:[%s2680_s1 + $0x68] sm:$0xff] }
  0x66   : > { %1474 = vmatpush.msra.mxu1 %v1383_v55  ;;  %1475 = vmatpush.msra.mxu2 %v1383_v55  ;;  %v1379_v62 = vld [vmem:[%s2680_s1 + $0x1d0] sm:$0xff]  ;;  %v508_v63 = vld [vmem:[%s2680_s1 + $0x60] sm:$0xff]  ;;  %v1378_v0 = vld [vmem:[%s2680_s1 + $0x1c8] sm:$0xff]  ;;  %s1176_s6 = sadd.s32 %s1521_s9, %s1471_s29  ;;  %s1616_s29 = scalar_lea.hbm %s2682_s3, 640 }
  0x67   : > { %625 = vmatpush.msra.mxu0 %v1383_v55  ;;  %766 = vmatpush.msra.mxu3 %v510_v59  ;;  %v507_v1 = vld [vmem:[%s2680_s1 + $0x58] sm:$0xff]  ;;  %v1377_v2 = vld [vmem:[%s2680_s1 + $0x1c0] sm:$0xff]  ;;  %v506_v3 = vld [vmem:[%s2680_s1 + $0x50] sm:$0xff]  ;;  %s1466_s10 = sshll.u32 %s1176_s6, 3 }
  0x68   : > { %1476 = vmatpush.msra.mxu1 %v1382_v56  ;;  %1477 = vmatpush.msra.mxu2 %v1382_v56  ;;  %v1376_v4 = vld [vmem:[%s2680_s1 + $0x1b8] sm:$0xff]  ;;  %v505_v5 = vld [vmem:[%s2680_s1 + $0x48] sm:$0xff]  ;;  %v1375_v6 = vld [vmem:[%s2680_s1 + $0x1b0] sm:$0xff]  ;;  %s1178_s5 = scalar_lea.hbm %s2682_s3, %s1466_s10 }
  0x69   : > { %626 = vmatpush.msra.mxu0 %v1382_v56  ;;  %767 = vmatpush.msra.mxu3 %v509_v61  ;;  %v504_v7 = vld [vmem:[%s2680_s1 + $0x40] sm:$0xff]  ;;  %v1374_v8 = vld [vmem:[%s2680_s1 + $0x1a8] sm:$0xff]  ;;  %v503_v9 = vld [vmem:[%s2680_s1 + $0x38] sm:$0xff]  ;;  %s1181_s8 = sshll.u32 %s1178_s5, 4  ;;  %s1182_s8 = int_to_ptr.hbm [resolvable:$true] %s1181_s8 }
  0x6a   : > { %1478 = vmatpush.msra.mxu1 %v1381_v57  ;;  %1479 = vmatpush.msra.mxu2 %v1381_v57  ;;  %v1373_v10 = vld [vmem:[%s2680_s1 + $0x1a0] sm:$0xff]  ;;  %v502_v11 = vld [vmem:[%s2680_s1 + $0x30] sm:$0xff]  ;;  %v1372_v12 = vld [vmem:[%s2680_s1 + $0x198] sm:$0xff]  ;;  %s1610_s24 = sshra.s32 %s1182_s8, 4  ;;  %s1611_s24 = int_to_ptr.hbm [resolvable:$true] %s1610_s24 }
  0x6b   : > { %627 = vmatpush.msra.mxu0 %v1381_v57  ;;  %768 = vmatpush.msra.mxu3 %v508_v63  ;;  %v501_v13 = vld [vmem:[%s2680_s1 + $0x28] sm:$0xff]  ;;  %v1371_v14 = vld [vmem:[%s2680_s1 + $0x190] sm:$0xff]  ;;  %v500_v15 = vld [vmem:[%s2680_s1 + $0x20] sm:$0xff]  ;;  %s1612_s27 = scalar_lea.hbm %s1611_s24, 80  ;;  %p1617_p6 = scmp.lt.s32.totalorder %s1611_s24, %s2682_s3 }
  0x6c   : > { %1480 = vmatpush.msra.mxu1 %v1380_v60  ;;  %1481 = vmatpush.msra.mxu2 %v1380_v60  ;;  %v1370_v16 = vld [vmem:[%s2680_s1 + $0x188] sm:$0xff]  ;;  %v499_v17 = vld [vmem:[%s2680_s1 + $0x18] sm:$0xff]  ;;  %v1369_v18 = vld [vmem:[%s2680_s1 + $0x180] sm:$0xff]  ;;  %p1613_p2 = scmp.ne.s32.totalorder %s1611_s24, %s1612_s27  ;;  %p1618_p7 = scmp.lt.s32.totalorder %s1616_s29, %s1612_s27 }
  0x6d   : > { %628 = vmatpush.msra.mxu0 %v1380_v60  ;;  %769 = vmatpush.msra.mxu3 %v507_v1  ;;  %v2024_v19 = vld [vmem:[%s1933_s20 + $0x60] sm:$0xff]  ;;  %v1415_v22 = vld [vmem:[%s2680_s1 + $0x2f0] sm:$0xff]  ;;  %v1414_v26 = vld [vmem:[%s2680_s1 + $0x2e8] sm:$0xff] }
  0x6e   : > { %1482 = vmatpush.msra.mxu1 %v1379_v62  ;;  %1483 = vmatpush.msra.mxu2 %v1379_v62  ;;  %v1416_v20 = vld [vmem:[%s2680_s1 + $0x2f8] sm:$0xff]  ;;  %v2036_v23 = vld [vmem:[%s1933_s20 + $0x30] sm:$0xff]  ;;  %v1413_v30 = vld [vmem:[%s2680_s1 + $0x2e0] sm:$0xff]  ;;  %p1614_p4 = pnand %p1613_p2, %p1767_p3  ;;  %p1619_p9 = por %p1618_p7, %p1617_p6 }
  0x6f   : > { %629 = vmatpush.msra.mxu0 %v1379_v62  ;;  %770 = vmatpush.msra.mxu3 %v506_v3  ;;  %v1400_v21 = vld [vmem:[%s2680_s1 + $0x278] sm:$0xff]  ;;  %v1399_v24 = vld [vmem:[%s2680_s1 + $0x270] sm:$0xff]  ;;  %v1398_v28 = vld [vmem:[%s2680_s1 + $0x268] sm:$0xff] }
  0x70   : > { %1484 = vmatpush.msra.mxu1 %v1378_v0  ;;  %1485 = vmatpush.msra.mxu2 %v1378_v0  ;;  %v527_v25 = vld [vmem:[%s2680_s1 + $0xf8] sm:$0xff]  ;;  %v498_v27 = vld [vmem:[%s2680_s1 + $0x10] sm:$0xff]  ;;  %v497_v31 = vld [vmem:[%s2680_s1 + $0x8] sm:$0xff]  ;;  %p1615_p5 = pneg %p1614_p4 }
  0x71   : > { %630 = vmatpush.msra.mxu0 %v1378_v0  ;;  %771 = vmatpush.msra.mxu3 %v505_v5  ;;  %v526_v29 = vld [vmem:[%s2680_s1 + $0xf0] sm:$0xff]  ;;  %v1397_v32 = vld [vmem:[%s2680_s1 + $0x260] sm:$0xff]  ;;  %v525_v33 = vld [vmem:[%s2680_s1 + $0xe8] sm:$0xff] }
  0x72   : > { %1486 = vmatpush.msra.mxu1 %v1377_v2  ;;  %1487 = vmatpush.msra.mxu2 %v1377_v2  ;;  %v2071_v34 = vld [vmem:[%s1933_s20 + $0x68] sm:$0xff]  ;;  %v1412_v35 = vld [vmem:[%s2680_s1 + $0x2d8] sm:$0xff]  ;;  %v1411_v38 = vld [vmem:[%s2680_s1 + $0x2d0] sm:$0xff]  ;;  %p1620_p10 = pnand %p1619_p9, %p1615_p5 }
  0x73   : > { %631 = vmatpush.msra.mxu0 %v1377_v2  ;;  %772 = vmatpush.msra.mxu3 %v504_v7  ;;  %v1396_v36 = vld [vmem:[%s2680_s1 + $0x258] sm:$0xff]  ;;  %v524_v37 = vld [vmem:[%s2680_s1 + $0xe0] sm:$0xff]  ;;  %v1395_v40 = vld [vmem:[%s2680_s1 + $0x250] sm:$0xff] }
  0x74   : > { %1488 = vmatpush.msra.mxu1 %v1376_v4  ;;  %1489 = vmatpush.msra.mxu2 %v1376_v4  ;;  %v2086_v39 = vld [vmem:[%s1933_s20 + $0x38] sm:$0xff]  ;;  %v2093_v41 = vld [vmem:[%s1933_s20 + $0x90] sm:$0xff]  ;;  %v496_v45 = vld [vmem:[%s2680_s1] sm:$0xff] }
  0x75   : > { %632 = vmatpush.msra.mxu0 %v1376_v4  ;;  %773 = vmatpush.msra.mxu3 %v503_v9  ;;  %v1410_v42 = vld [vmem:[%s2680_s1 + $0x2c8] sm:$0xff]  ;;  %v523_v43 = vld [vmem:[%s2680_s1 + $0xd8] sm:$0xff]  ;;  %v1409_v46 = vld [vmem:[%s2680_s1 + $0x2c0] sm:$0xff] }
  0x76   : > { %1490 = vmatpush.msra.mxu1 %v1375_v6  ;;  %1491 = vmatpush.msra.mxu2 %v1375_v6  ;;  %v1394_v44 = vld [vmem:[%s2680_s1 + $0x248] sm:$0xff]  ;;  %v522_v47 = vld [vmem:[%s2680_s1 + $0xd0] sm:$0xff]  ;;  %v1393_v48 = vld [vmem:[%s2680_s1 + $0x240] sm:$0xff] }
  0x77   : > { %633 = vmatpush.msra.mxu0 %v1375_v6  ;;  %774 = vmatpush.msra.mxu3 %v502_v11  ;;  %v358_v49 = vld [vmem:[%s1933_s20] sm:$0xff]  ;;  %v2120_v50 = vld [vmem:[%s1933_s20 + $0x78] sm:$0xff]  ;;  %v521_v53 = vld [vmem:[%s2680_s1 + $0xc8] sm:$0xff] }
  0x78   : > { %1492 = vmatpush.msra.mxu1 %v1374_v8  ;;  %1493 = vmatpush.msra.mxu2 %v1374_v8  ;;  %v1408_v51 = vld [vmem:[%s2680_s1 + $0x2b8] sm:$0xff]  ;;  %v1407_v54 = vld [vmem:[%s2680_s1 + $0x2b0] sm:$0xff]  ;;  %v2135_v55 = vld [vmem:[%s1933_s20 + $0x48] sm:$0xff] }
  0x79   : > { %634 = vmatpush.msra.mxu0 %v1374_v8  ;;  %775 = vmatpush.msra.mxu3 %v501_v13  ;;  %v1392_v52 = vld [vmem:[%s2680_s1 + $0x238] sm:$0xff]  ;;  %v1391_v56 = vld [vmem:[%s2680_s1 + $0x230] sm:$0xff]  ;;  %v520_v57 = vld [vmem:[%s2680_s1 + $0xc0] sm:$0xff] }
  0x7a   : > { %1494 = vmatpush.msra.mxu1 %v1373_v10  ;;  %1495 = vmatpush.msra.mxu2 %v1373_v10  ;;  %v1406_v58 = vld [vmem:[%s2680_s1 + $0x2a8] sm:$0xff]  ;;  %v1448_v59 = vld [vmem:[%s2680_s1 + $0x3f8] sm:$0xff]  ;;  %v1405_v62 = vld [vmem:[%s2680_s1 + $0x2a0] sm:$0xff] }
  0x7b   : > { %635 = vmatpush.msra.mxu0 %v1373_v10  ;;  %776 = vmatpush.msra.mxu3 %v500_v15  ;;  %v1390_v60 = vld [vmem:[%s2680_s1 + $0x228] sm:$0xff]  ;;  %v2155_v61 = vld [vmem:[%s1933_s20 + $0x98] sm:$0xff]  ;;  %v1389_v0 = vld [vmem:[%s2680_s1 + $0x220] sm:$0xff] }
  0x7c   : > { %1496 = vmatpush.msra.mxu1 %v1372_v12  ;;  %1497 = vmatpush.msra.mxu2 %v1372_v12  ;;  %v519_v63 = vld [vmem:[%s2680_s1 + $0xb8] sm:$0xff]  ;;  %v1447_v1 = vld [vmem:[%s2680_s1 + $0x3f0] sm:$0xff]  ;;  %v517_v9 = vld [vmem:[%s2680_s1 + $0xa8] sm:$0xff] }
  0x7d   : > { %636 = vmatpush.msra.mxu0 %v1372_v12  ;;  %777 = vmatpush.msra.mxu3 %v499_v17  ;;  %v2171_v2 = vld [vmem:[%s1933_s20 + $0x80] sm:$0xff]  ;;  %v518_v5 = vld [vmem:[%s2680_s1 + $0xb0] sm:$0xff]  ;;  %v1402_v10 = vld [vmem:[%s2680_s1 + $0x288] sm:$0xff] }
  0x7e   : > { %1498 = vmatpush.msra.mxu1 %v1371_v14  ;;  %1499 = vmatpush.msra.mxu2 %v1371_v14  ;;  %v1404_v3 = vld [vmem:[%s2680_s1 + $0x298] sm:$0xff]  ;;  %v1403_v6 = vld [vmem:[%s2680_s1 + $0x290] sm:$0xff]  ;;  %v359_v11 = vld [vmem:[%s1933_s20 + $0x8] sm:$0xff] }
  0x7f   : > { %637 = vmatpush.msra.mxu0 %v1371_v14  ;;  %778 = vmatpush.msra.mxu3 %v498_v27  ;;  %v1388_v4 = vld [vmem:[%s2680_s1 + $0x218] sm:$0xff]  ;;  %v2186_v7 = vld [vmem:[%s1933_s20 + $0x50] sm:$0xff]  ;;  %v516_v13 = vld [vmem:[%s2680_s1 + $0xa0] sm:$0xff] }
  0x80   : > { %1500 = vmatpush.msra.mxu1 %v1370_v16  ;;  %1501 = vmatpush.msra.mxu2 %v1370_v16  ;;  %v1387_v8 = vld [vmem:[%s2680_s1 + $0x210] sm:$0xff]  ;;  %v1386_v12 = vld [vmem:[%s2680_s1 + $0x208] sm:$0xff]  ;;  %v1401_v14 = vld [vmem:[%s2680_s1 + $0x280] sm:$0xff] }
  0x81   : > { %638 = vmatpush.msra.mxu0 %v1370_v16  ;;  %779 = vmatpush.msra.mxu3 %v497_v31  ;;  %v1446_v15 = vld [vmem:[%s2680_s1 + $0x3e8] sm:$0xff]  ;;  %v1385_v16 = vld [vmem:[%s2680_s1 + $0x200] sm:$0xff]  ;;  %v542_v27 = vld [vmem:[%s2680_s1 + $0x170] sm:$0xff] }
  0x82   : > { %1502 = vmatpush.msra.mxu1 %v1369_v18  ;;  %1503 = vmatpush.msra.mxu2 %v1369_v18  ;;  %v2216_v17 = vld [vmem:[%s1933_s20 + $0x34] sm:$0xff] }
  0x83   : > { %652 = vmatmul.f32.vlgmr.msra.gmra.mxu1 %v2024_v19  ;;  %639 = vmatpush.msra.mxu0 %v1369_v18  ;;  %v1432_v18 = vld [vmem:[%s2680_s1 + $0x378] sm:$0xff] }
  0x84   : > { %718 = vmatpush.msrb.mxu2 %v1416_v20  ;;  %671 = vmatpush.msrb.mxu1 %v1400_v21  ;;  %v2222_v20 = vld [vmem:[%s1933_s20 + $0x32] sm:$0xff] }
  0x85   : > { %640 = vmatmul.f32.vlgmr.msra.gmra.mxu0 %v2036_v23  ;;  %664 = vmatmul.f32.vlgmr.msra.gmra.mxu2 %v2093_v41  ;;  %v515_v21 = vld [vmem:[%s2680_s1 + $0x98] sm:$0xff] }
  0x86   : > { %719 = vmatpush.msrb.mxu2 %v1415_v22  ;;  %672 = vmatpush.msrb.mxu1 %v1399_v24  ;;  %v543_v22 = vld [vmem:[%s2680_s1 + $0x178] sm:$0xff]  ;;  %v1431_v24 = vld [vmem:[%s2680_s1 + $0x370] sm:$0xff] }
  0x87   : > { %812 = vmatpush.msrb.mxu0 %v527_v25  ;;  %780 = vmatpush.msra.mxu3 %v496_v45  ;;  %v1445_v25 = vld [vmem:[%s2680_s1 + $0x3e0] sm:$0xff]  ;;  %v1444_v31 = vld [vmem:[%s2680_s1 + $0x3d8] sm:$0xff]  ;;  %v2289_v45 = vld [vmem:[%s2680_s1 + $0x470] sm:$0xff] }
  0x88   : > { %720 = vmatpush.msrb.mxu2 %v1414_v26  ;;  %673 = vmatpush.msrb.mxu1 %v1398_v28  ;;  %v514_v26 = vld [vmem:[%s2680_s1 + $0x90] sm:$0xff] }
  0x89   : > { %813 = vmatpush.msrb.mxu0 %v526_v29  ;;  %781 = vmatmul.f32.vlgmr.msra.gmra.mxu3 %v358_v49  ;;  %v360_v28 = vld [vmem:[%s1933_s20 + $0x18] sm:$0xff]  ;;  %v1430_v29 = vld [vmem:[%s2680_s1 + $0x368] sm:$0xff] }
  0x8a   : > { %721 = vmatpush.msrb.mxu2 %v1413_v30  ;;  %674 = vmatpush.msrb.mxu1 %v1397_v32  ;;  %v513_v30 = vld [vmem:[%s2680_s1 + $0x88] sm:$0xff]  ;;  %v1429_v32 = vld [vmem:[%s2680_s1 + $0x360] sm:$0xff] }
  0x8b   : > { %814 = vmatpush.msrb.mxu0 %v525_v33  ;;  %655 = vmatmul.f32.gmra.mxu1 %v2071_v34  ;;  %v541_v33 = vld [vmem:[%s2680_s1 + $0x168] sm:$0xff] }
  0x8c   : > { %722 = vmatpush.msrb.mxu2 %v1412_v35  ;;  %675 = vmatpush.msrb.mxu1 %v1396_v36  ;;  %v512_v35 = vld [vmem:[%s2680_s1 + $0x80] sm:$0xff]  ;;  %v2302_v49 = vld [vmem:[%s2680_s1 + $0x468] sm:$0xff] }
  0x8d   : > { %815 = vmatpush.msrb.mxu0 %v524_v37  ;;  %1033 = vmatpush.msrb.mxu3 %v1448_v59  ;;  %v2264_v36 = vld [vmem:[%s1933_s20 + $0x3c] sm:$0xff] }
  0x8e   : > { %723 = vmatpush.msrb.mxu2 %v1411_v38  ;;  %643 = vmatmul.f32.gmra.mxu0 %v2086_v39  ;;  %v394_v37 = vld [vmem:[%s1933_s20 + $0x2] sm:$0xff]  ;;  %v2268_v38 = vld [vmem:[%s1933_s20 + $0x3a] sm:$0xff] }
  0x8f   : > { %676 = vmatpush.msrb.mxu1 %v1395_v40  ;;  %816 = vmatpush.msrb.mxu0 %v523_v43  ;;  %v2273_v40 = vld [vmem:[%s2680_s1 + $0x478] sm:$0xff]  ;;  %v538_v59 = vld [vmem:[%s2680_s1 + $0x150] sm:$0xff] }
  0x90   : > { %724 = vmatpush.msrb.mxu2 %v1410_v42  ;;  %1034 = vmatpush.msrb.mxu3 %v1447_v1  ;;  %v1443_v42 = vld [vmem:[%s2680_s1 + $0x3d0] sm:$0xff]  ;;  %v1428_v43 = vld [vmem:[%s2680_s1 + $0x358] sm:$0xff] }
  0x91   : > { %677 = vmatpush.msrb.mxu1 %v1394_v44  ;;  %817 = vmatpush.msrb.mxu0 %v522_v47  ;;  %v540_v44 = vld [vmem:[%s2680_s1 + $0x160] sm:$0xff]  ;;  %v1439_v1 = vld [vmem:[%s2680_s1 + $0x3b0] sm:$0xff] }
  0x92   : > { %725 = vmatpush.msrb.mxu2 %v1409_v46  ;;  %784 = vmatmul.f32.gmra.mxu3 %v359_v11  ;;  %v1442_v46 = vld [vmem:[%s2680_s1 + $0x3c8] sm:$0xff]  ;;  %v361_v47 = vld [vmem:[%s1933_s20 + $0x20] sm:$0xff] }
  0x93   : > { %678 = vmatpush.msrb.mxu1 %v1393_v48  ;;  %818 = vmatpush.msrb.mxu0 %v521_v53  ;;  %v1427_v48 = vld [vmem:[%s2680_s1 + $0x350] sm:$0xff]  ;;  %v1426_v53 = vld [vmem:[%s2680_s1 + $0x348] sm:$0xff] }
  0x94   : > { %658 = vmatmul.f32.gmra.mxu1 %v2120_v50  ;;  %726 = vmatpush.msrb.mxu2 %v1408_v51  ;;  %v539_v51 = vld [vmem:[%s2680_s1 + $0x158] sm:$0xff] }
  0x95   : > { %679 = vmatpush.msrb.mxu1 %v1392_v52  ;;  %819 = vmatpush.msrb.mxu0 %v520_v57  ;;  %v1441_v52 = vld [vmem:[%s2680_s1 + $0x3c0] sm:$0xff] }
  0x96   : > { %727 = vmatpush.msrb.mxu2 %v1407_v54  ;;  %646 = vmatmul.f32.gmra.mxu0 %v2135_v55  ;;  %v2315_v54 = vld [vmem:[%s1933_s20 + $0x4c] sm:$0xff]  ;;  %v396_v11 = vld [vmem:[%s1933_s20 + $0x1a] sm:$0xff] }
  0x97   : > { %680 = vmatpush.msrb.mxu1 %v1391_v56  ;;  %667 = vmatmul.f32.gmra.mxu2 %v2155_v61  ;;  %v2320_v56 = vld [vmem:[%s2680_s1 + $0x460] sm:$0xff] }
  0x98   : > { %728 = vmatpush.msrb.mxu2 %v1406_v58  ;;  %820 = vmatpush.msrb.mxu0 %v519_v63  ;;  %v395_v57 = vld [vmem:[%s1933_s20 + $0xa] sm:$0xff]  ;;  %v2341_v63 = vld [vmem:[%s2680_s1 + $0x458] sm:$0xff] }
  0x99   : > { %681 = vmatpush.msrb.mxu1 %v1390_v60  ;;  %1035 = vmatpush.msrb.mxu3 %v1446_v15  ;;  %v2324_v58 = vld [vmem:[%s1933_s20 + $0x4a] sm:$0xff]  ;;  %v1440_v60 = vld [vmem:[%s2680_s1 + $0x3b8] sm:$0xff] }
  0x9a   : > { %729 = vmatpush.msrb.mxu2 %v1405_v62  ;;  %821 = vmatpush.msrb.mxu0 %v518_v5  ;;  %v1425_v62 = vld [vmem:[%s2680_s1 + $0x340] sm:$0xff] }
  0x9b   : > { %682 = vmatpush.msrb.mxu1 %v1389_v0  ;;  %1036 = vmatpush.msrb.mxu3 %v1445_v25  ;;  %v537_v0 = vld [vmem:[%s2680_s1 + $0x148] sm:$0xff]  ;;  %v536_v5 = vld [vmem:[%s2680_s1 + $0x140] sm:$0xff]  ;;  %v1435_v25 = vld [vmem:[%s2680_s1 + $0x390] sm:$0xff] }
  0x9c   : > { %661 = vmatmul.f32.gmra.mxu1 %v2171_v2  ;;  %730 = vmatpush.msrb.mxu2 %v1404_v3  ;;  %v1424_v3 = vld [vmem:[%s2680_s1 + $0x338] sm:$0xff]  ;;  %v2396_v15 = vld [vmem:[%s2680_s1 + $0x440] sm:$0xff] }
  0x9d   : > { %683 = vmatpush.msrb.mxu1 %v1388_v4  ;;  %822 = vmatpush.msrb.mxu0 %v517_v9  ;;  %v2357_v4 = vld [vmem:[%s2680_s1 + $0x450] sm:$0xff] }
  0x9e   : > { %731 = vmatpush.msrb.mxu2 %v1403_v6  ;;  %649 = vmatmul.f32.gmra.mxu0 %v2186_v7  ;;  %v1438_v6 = vld [vmem:[%s2680_s1 + $0x3a8] sm:$0xff] }
  0x9f   : > { %684 = vmatpush.msrb.mxu1 %v1387_v8  ;;  %823 = vmatpush.msrb.mxu0 %v516_v13  ;;  %v1423_v8 = vld [vmem:[%s2680_s1 + $0x330] sm:$0xff]  ;;  %v535_v13 = vld [vmem:[%s2680_s1 + $0x138] sm:$0xff] }
  0xa0   : > { %732 = vmatpush.msrb.mxu2 %v1402_v10  ;;  %787 = vmatmul.f32.gmra.mxu3 %v360_v28  ;;  %v2369_v9 = vld [vmem:[%s1933_s20 + $0x54] sm:$0xff] }
  0xa1   : > { %685 = vmatpush.msrb.mxu1 %v1386_v12  ;;  %824 = vmatpush.msrb.mxu0 %v515_v21  ;;  %v2375_v10 = vld [vmem:[%s2680_s1 + $0x448] sm:$0xff]  ;;  %v1421_v21 = vld [vmem:[%s2680_s1 + $0x320] sm:$0xff]  ;;  %v2430_v28 = vld [vmem:[%s2680_s1 + $0x430] sm:$0xff] }
  0xa2   : > { %733 = vmatpush.msrb.mxu2 %v1401_v14  ;;  %1037 = vmatpush.msrb.mxu3 %v1444_v31  ;;  %v2379_v12 = vld [vmem:[%s1933_s20 + $0x52] sm:$0xff]  ;;  %v532_v31 = vld [vmem:[%s2680_s1 + $0x120] sm:$0xff] }
  0xa3   : > { %686 = vmatpush.msrb.mxu1 %v1385_v16  ;;  %734 = vmatmul.f32.vlgmr.msrb.gmra.mxu2 %v2216_v17  ;;  %v1422_v14 = vld [vmem:[%s2680_s1 + $0x328] sm:$0xff]  ;;  %v534_v16 = vld [vmem:[%s2680_s1 + $0x130] sm:$0xff] }
  0xa4   : > { %986 = vmatpush.msra.mxu2 %v1432_v18  ;;  %687 = vmatmul.f32.vlgmr.msrb.gmra.mxu1 %v2222_v20  ;;  %v1436_v18 = vld [vmem:[%s2680_s1 + $0x398] sm:$0xff] }
  0xa5   : > { %859 = vmatpush.msra.mxu1 %v543_v22  ;;  %825 = vmatpush.msrb.mxu0 %v514_v26  ;;  %v2412_v22 = vld [vmem:[%s2680_s1 + $0x438] sm:$0xff] }
  0xa6   : > { %987 = vmatpush.msra.mxu2 %v1431_v24  ;;  %1038 = vmatpush.msrb.mxu3 %v1443_v42  ;;  %v533_v24 = vld [vmem:[%s2680_s1 + $0x128] sm:$0xff]  ;;  %v1420_v26 = vld [vmem:[%s2680_s1 + $0x318] sm:$0xff] }
  0xa7   : > { %860 = vmatpush.msra.mxu1 %v542_v27  ;;  %826 = vmatpush.msrb.mxu0 %v513_v30  ;;  %v2424_v27 = vld [vmem:[%s1933_s20 + $0x64] sm:$0xff] }
  0xa8   : > { %988 = vmatpush.msra.mxu2 %v1430_v29  ;;  %1039 = vmatpush.msrb.mxu3 %v1442_v46  ;;  %v397_v29 = vld [vmem:[%s1933_s20 + $0x22] sm:$0xff]  ;;  %v2469_v46 = vld [vmem:[%s1933_s20 + $0x6a] sm:$0xff] }
  0xa9   : > { %861 = vmatpush.msra.mxu1 %v541_v33  ;;  %827 = vmatpush.msrb.mxu0 %v512_v35  ;;  %v2434_v30 = vld [vmem:[%s1933_s20 + $0x62] sm:$0xff] }
  0xaa   : > { %989 = vmatpush.msra.mxu2 %v1429_v32  ;;  %828 = vmatmul.f32.vlgmr.msrb.gmra.mxu0 %v394_v37  ;;  %v1419_v32 = vld [vmem:[%s2680_s1 + $0x310] sm:$0xff]  ;;  %v1454_v33 = vld [vmem:[%s2680_s1 + $0x428] sm:$0xff]  ;;  %v531_v35 = vld [vmem:[%s2680_s1 + $0x118] sm:$0xff] }
  0xab   : > { %737 = vmatmul.f32.gmra.mxu2 %v2264_v36  ;;  %1080 = vmatpush.msra.mxu0 %v2273_v40  ;;  %v1433_v37 = vld [vmem:[%s2680_s1 + $0x380] sm:$0xff]  ;;  %v1418_v42 = vld [vmem:[%s2680_s1 + $0x308] sm:$0xff] }
  0xac   : > { %690 = vmatmul.f32.gmra.mxu1 %v2268_v38  ;;  %990 = vmatpush.msra.mxu2 %v1428_v43  ;;  %v1453_v43 = vld [vmem:[%s2680_s1 + $0x420] sm:$0xff] }
  0xad   : > { %862 = vmatpush.msra.mxu1 %v540_v44  ;;  %1081 = vmatpush.msra.mxu0 %v2289_v45  ;;  %v2465_v44 = vld [vmem:[%s1933_s20 + $0x6c] sm:$0xff] }
  0xae   : > { %790 = vmatmul.f32.gmra.mxu3 %v361_v47  ;;  %991 = vmatpush.msra.mxu2 %v1427_v48  ;;  %v1417_v47 = vld [vmem:[%s2680_s1 + $0x300] sm:$0xff] }
  0xaf   : > { %1082 = vmatpush.msra.mxu0 %v2302_v49  ;;  %863 = vmatpush.msra.mxu1 %v539_v51  ;;  %v404_v48 = vld [vmem:[%s1933_s20 + $0x7a] sm:$0xff] }
  0xb0   : > { %1040 = vmatpush.msrb.mxu3 %v1441_v52  ;;  %992 = vmatpush.msra.mxu2 %v1426_v53  ;;  %v528_v51 = vld [vmem:[%s2680_s1 + $0x100] sm:$0xff] }
  0xb1   : > { %1083 = vmatpush.msra.mxu0 %v2320_v56  ;;  %864 = vmatpush.msra.mxu1 %v538_v59  ;;  %v1449_v52 = vld [vmem:[%s2680_s1 + $0x400] sm:$0xff] }
  0xb2   : > { %831 = vmatmul.f32.gmra.mxu0 %v395_v57  ;;  %1041 = vmatpush.msrb.mxu3 %v1440_v60  ;;  %v405_v53 = vld [vmem:[%s1933_s20 + $0x82] sm:$0xff]  ;;  %v406_v57 = vld [vmem:[%s1933_s20 + $0x92] sm:$0xff]  ;;  %v407_v59 = vld [vmem:[%s1933_s20 + $0x9a] sm:$0xff] }
  0xb3   : > { %740 = vmatmul.f32.gmra.mxu2 %v2315_v54  ;;  %1084 = vmatpush.msra.mxu0 %v2341_v63  ;;  %v430_v60 = vld [vmem:[%s1933_s20 + $0x4] sm:$0xff] }
  0xb4   : > { %693 = vmatmul.f32.gmra.mxu1 %v2324_v58  ;;  %993 = vmatpush.msra.mxu2 %v1425_v62  ;;  %v431_v62 = vld [vmem:[%s1933_s20 + $0xc] sm:$0xff] }
  0xb5   : > { %865 = vmatpush.msra.mxu1 %v537_v0  ;;  %1042 = vmatpush.msrb.mxu3 %v1439_v1  ;;  %v432_v0 = vld [vmem:[%s1933_s20 + $0x1c] sm:$0xff] }
  0xb6   : > { %793 = vmatmul.f32.gmra.mxu3 %v2036_v23  ;;  %994 = vmatpush.msra.mxu2 %v1424_v3  ;;  %v1437_v23 = vld [vmem:[%s2680_s1 + $0x3a0] sm:$0xff] }
  0xb7   : > { %1085 = vmatpush.msra.mxu0 %v2357_v4  ;;  %866 = vmatpush.msra.mxu1 %v536_v5  ;;  %v433_v3 = vld [vmem:[%s1933_s20 + $0x24] sm:$0xff] }
  0xb8   : > { %1043 = vmatpush.msrb.mxu3 %v1438_v6  ;;  %995 = vmatpush.msra.mxu2 %v1423_v8  ;;  %v408_v6 = vld [vmem:[%s1933_s20 + $0xaa] sm:$0xff] }
  0xb9   : > { %1086 = vmatpush.msra.mxu0 %v2375_v10  ;;  %867 = vmatpush.msra.mxu1 %v535_v13 }
  0xba   : > { %834 = vmatmul.f32.gmra.mxu0 %v396_v11  ;;  %1044 = vmatpush.msrb.mxu3 %v1437_v23  ;;  %v409_v11 = vld [vmem:[%s1933_s20 + $0xb2] sm:$0xff] }
  0xbb   : > { %743 = vmatmul.f32.gmra.mxu2 %v2369_v9  ;;  %1087 = vmatpush.msra.mxu0 %v2396_v15 }
  0xbc   : > { %696 = vmatmul.f32.gmra.mxu1 %v2379_v12  ;;  %996 = vmatpush.msra.mxu2 %v1422_v14 }
  0xbd   : > { %868 = vmatpush.msra.mxu1 %v534_v16  ;;  %1045 = vmatpush.msrb.mxu3 %v1436_v18 }
  0xbe   : > { %796 = vmatmul.f32.gmra.mxu3 %v2086_v39  ;;  %997 = vmatpush.msra.mxu2 %v1421_v21  ;;  %v1434_v39 = vld [vmem:[%s2680_s1 + $0x388] sm:$0xff] }
  0xbf   : > { %1088 = vmatpush.msra.mxu0 %v2412_v22  ;;  %869 = vmatpush.msra.mxu1 %v533_v24 }
  0xc0   : > { %1046 = vmatpush.msrb.mxu3 %v1435_v25  ;;  %998 = vmatpush.msra.mxu2 %v1420_v26 }
  0xc1   : > { %1089 = vmatpush.msra.mxu0 %v2430_v28  ;;  %870 = vmatpush.msra.mxu1 %v532_v31 }
  0xc2   : > { %837 = vmatmul.f32.gmra.mxu0 %v397_v29  ;;  %1047 = vmatpush.msrb.mxu3 %v1434_v39 }
  0xc3   : > { %746 = vmatmul.f32.gmra.mxu2 %v2424_v27  ;;  %1090 = vmatpush.msra.mxu0 %v1454_v33 }
  0xc4   : > { %699 = vmatmul.f32.gmra.mxu1 %v2434_v30  ;;  %999 = vmatpush.msra.mxu2 %v1419_v32 }
  0xc5   : > { %871 = vmatpush.msra.mxu1 %v531_v35  ;;  %1048 = vmatpush.msrb.mxu3 %v1433_v37 }
  0xc6   : > { %799 = vmatmul.f32.gmra.mxu3 %v2135_v55  ;;  %1000 = vmatpush.msra.mxu2 %v1418_v42  ;;  %v530_v55 = vld [vmem:[%s2680_s1 + $0x110] sm:$0xff] }
  0xc7   : > { %1091 = vmatpush.msra.mxu0 %v1453_v43  ;;  %1504 = vmatpush.msra.mxu3 %v2273_v40  ;;  %v1452_v40 = vld [vmem:[%s2680_s1 + $0x418] sm:$0xff] }
  0xc8   : > { %872 = vmatpush.msra.mxu1 %v530_v55  ;;  %1001 = vmatpush.msra.mxu2 %v1417_v47  ;;  %v375_v55 = vld [vmem:[%s1933_s20 + $0xc8] sm:$0xff] }
  0xc9   : > { %1505 = vmatpush.msra.mxu3 %v2289_v45  ;;  %1092 = vmatpush.msra.mxu0 %v1452_v40  ;;  %v2490_v45 = vld [vmem:[%s1933_s20 + $0x7c] sm:$0xff] }
  0xca   : > { %840 = vmatmul.f32.gmra.mxu0 %v2222_v20  ;;  %v529_v20 = vld [vmem:[%s2680_s1 + $0x108] sm:$0xff] }
  0xcb   : > { %749 = vmatmul.f32.gmra.mxu2 %v2465_v44  ;;  %1506 = vmatpush.msra.mxu3 %v2302_v49  ;;  %v1451_v49 = vld [vmem:[%s2680_s1 + $0x410] sm:$0xff] }
  0xcc   : > { %702 = vmatmul.f32.gmra.mxu1 %v2469_v46  ;;  %1093 = vmatpush.msra.mxu0 %v1451_v49 }
  0xcd   : > { %873 = vmatpush.msra.mxu1 %v529_v20  ;;  %1507 = vmatpush.msra.mxu3 %v2320_v56  ;;  %v442_v56 = vld [vmem:[%s1933_s20 + $0x94] sm:$0xff] }
  0xce   : > { %802 = vmatmul.f32.gmra.mxu3 %v2186_v7  ;;  %v1450_v7 = vld [vmem:[%s2680_s1 + $0x408] sm:$0xff] }
  0xcf   : > { %1508 = vmatpush.msra.mxu3 %v2341_v63  ;;  %874 = vmatpush.msra.mxu1 %v528_v51 }
  0xd0   : > { %1094 = vmatpush.msra.mxu0 %v1450_v7 }
  0xd1   : > { %1509 = vmatpush.msra.mxu3 %v2357_v4 }
  0xd2   : > { %843 = vmatmul.f32.gmra.mxu0 %v2268_v38  ;;  %v441_v38 = vld [vmem:[%s1933_s20 + $0x84] sm:$0xff] }
  0xd3   : > { %752 = vmatmul.f32.gmra.mxu2 %v2490_v45  ;;  %1095 = vmatpush.msra.mxu0 %v1449_v52 }
  0xd4   : > { %705 = vmatmul.f32.gmra.mxu1 %v404_v48  ;;  %1510 = vmatpush.msra.mxu3 %v2375_v10 }
  0xd6   : > { %805 = vmatmul.f32.gmra.mxu3 %v2024_v19 }
  0xd7   : > { %1511 = vmatpush.msra.mxu3 %v2396_v15 }
  0xd9   : > { %1512 = vmatpush.msra.mxu3 %v2412_v22  ;;  %v444_v22 = vld [vmem:[%s1933_s20 + $0xac] sm:$0xff] }
  0xda   : > { %846 = vmatmul.f32.gmra.mxu0 %v2324_v58  ;;  %v443_v58 = vld [vmem:[%s1933_s20 + $0x9c] sm:$0xff] }
  0xdb   : > { %755 = vmatmul.f32.gmra.mxu2 %v441_v38  ;;  %1513 = vmatpush.msra.mxu3 %v2430_v28 }
  0xdc   : > { %708 = vmatmul.f32.gmra.mxu1 %v405_v53 }
  0xdd   : > { %1514 = vmatpush.msra.mxu3 %v1454_v33  ;;  %v445_v33 = vld [vmem:[%s1933_s20 + $0xb4] sm:$0xff] }
  0xde   : > { %808 = vmatmul.f32.gmra.mxu3 %v2071_v34 }
  0xdf   : > { %1515 = vmatpush.msra.mxu3 %v1453_v43 }
  0xe1   : > { %1516 = vmatpush.msra.mxu3 %v1452_v40 }
  0xe2   : > { %849 = vmatmul.f32.gmra.mxu0 %v2379_v12  ;;  %v372_v12 = vld [vmem:[%s1933_s20 + $0xa8] sm:$0xff] }
  0xe3   : > { %758 = vmatmul.f32.gmra.mxu2 %v442_v56  ;;  %1517 = vmatpush.msra.mxu3 %v1451_v49 }
  0xe4   : > { %711 = vmatmul.f32.gmra.mxu1 %v406_v57 }
  0xe5   : > { %1518 = vmatpush.msra.mxu3 %v1450_v7 }
  0xe6   : > { %1049 = vmatmul.f32.vlgmr.msrb.gmra.mxu3 %v2434_v30 }
  0xe7   : > { %1519 = vmatpush.msra.mxu3 %v1449_v52 }
  0xea   : > { %852 = vmatmul.f32.gmra.mxu0 %v2434_v30  ;;  %v374_v30 = vld [vmem:[%s1933_s20 + $0xc0] sm:$0xff] }
  0xeb   : > { %761 = vmatmul.f32.gmra.mxu2 %v443_v58 }
  0xec   : > { %714 = vmatmul.f32.gmra.mxu1 %v407_v59 }
  0xee   : > { %1052 = vmatmul.f32.gmra.mxu3 %v2469_v46 }
  0xf2   : > { %855 = vmatmul.f32.gmra.mxu0 %v2469_v46 }
  0xf3   : > { %1002 = vmatmul.f32.vlgmr.msra.gmra.mxu2 %v2024_v19 }
  0xf4   : > { %875 = vmatmul.f32.vlgmr.msra.gmra.mxu1 %v430_v60 }
  0xf6   : > { %1055 = vmatmul.f32.gmra.mxu3 %v404_v48 }
  0xfa   : > { %1096 = vmatmul.f32.vlgmr.msra.gmra.mxu0 %v2424_v27 }
  0xfb   : > { %1005 = vmatmul.f32.gmra.mxu2 %v2071_v34 }
  0xfc   : > { %878 = vmatmul.f32.gmra.mxu1 %v431_v62 }
  0xfe   : > { %1058 = vmatmul.f32.gmra.mxu3 %v405_v53 }
 0x100   : > { %v2534_v63 = vpop.f32.mrf.mxu1 }
 0x102   : > { %v641_v1 = vpop.f32.mrf.mxu0  ;;  %1099 = vmatmul.f32.gmra.mxu0 %v2465_v44 }
 0x103   : > { %1008 = vmatmul.f32.gmra.mxu2 %v2120_v50 }
 0x104   : > { %881 = vmatmul.f32.gmra.mxu1 %v432_v0 }
 0x106   : > { %1061 = vmatmul.f32.gmra.mxu3 %v406_v57 }
 0x108   : > { %v2539_v19 = vpop.f32.mrf.mxu1  ;;  %v2546_v50 = vpop.f32.mrf.mxu2 }
 0x10a   : > { %1102 = vmatmul.f32.gmra.mxu0 %v2490_v45  ;;  %v446_v45 = vld [vmem:[%s1933_s20 + $0xc4] sm:$0xff] }
 0x10b   : > { %1011 = vmatmul.f32.gmra.mxu2 %v2171_v2  ;;  %v644_v34 = vpop.f32.mrf.mxu0 }
 0x10c   : > { %884 = vmatmul.f32.gmra.mxu1 %v433_v3  ;;  %v782_v8 = vpop.f32.mrf.mxu3 }
 0x10e   : > { %1064 = vmatmul.f32.gmra.mxu3 %v407_v59 }
 0x111   : > { %v2544_v4 = vpop.f32.mrf.mxu1 }
 0x112   : > { %1105 = vmatmul.f32.gmra.mxu0 %v441_v38 }
 0x113   : > { %1014 = vmatmul.f32.gmra.mxu2 %v2093_v41  ;;  %v647_v5 = vpop.f32.mrf.mxu0 }
 0x114   : > { %887 = vmatmul.f32.gmra.mxu1 %v2216_v17 }
 0x115   : > { %v785_v23 = vpop.f32.mrf.mxu3 }
 0x116   : > { %1067 = vmatmul.f32.gmra.mxu3 %v408_v6 }
 0x119   : > { %v2551_v2 = vpop.f32.mrf.mxu1 }
 0x11a   : > { %1108 = vmatmul.f32.gmra.mxu0 %v442_v56  ;;  %v2555_v10 = vpop.f32.mrf.mxu2 }
 0x11b   : > { %1017 = vmatmul.f32.gmra.mxu2 %v2155_v61  ;;  %v650_v41 = vpop.f32.mrf.mxu0  ;;  %v410_v61 = vld [vmem:[%s1933_s20 + $0xc2] sm:$0xff] }
 0x11c   : > { %890 = vmatmul.f32.gmra.mxu1 %v2264_v36  ;;  %v373_v36 = vld [vmem:[%s1933_s20 + $0xb0] sm:$0xff] }
 0x11e   : > { %1070 = vmatmul.f32.gmra.mxu3 %v409_v11 }
 0x121   : > { %v688_v17 = vpop.f32.mrf.mxu1 }
 0x122   : > { %v689_v13 = vadd.f32 %v688_v17, %v641_v1  ;;  %1111 = vmatmul.f32.gmra.mxu0 %v443_v58 }
 0x123   : > { %1020 = vmatmul.f32.gmra.mxu2 %v372_v12  ;;  %v788_v26 = vpop.f32.mrf.mxu3 }
 0x124   : > { %893 = vmatmul.f32.gmra.mxu1 %v2315_v54  ;;  %v411_v54 = vld [vmem:[%s1933_s20 + $0xca] sm:$0xff] }
 0x126   : > { %v735_v14 = vpop.f32.mrf.mxu2  ;;  %1073 = vmatmul.f32.gmra.mxu3 %v410_v61 }
 0x127   : > { %v736_v15 = vadd.f32 %v735_v14, %v689_v13  ;;  %v829_v18 = vpop.f32.mrf.mxu0 }
 0x129   : > { %v783_v16 = vadd.f32 %v782_v8, %v736_v15  ;;  %v691_v21 = vpop.f32.mrf.mxu1 }
 0x12a   : > { %v692_v24 = vadd.f32 %v691_v21, %v644_v34  ;;  %1114 = vmatmul.f32.gmra.mxu0 %v444_v22 }
 0x12b   : > { %v2563_v25 = vadd.f32 %v829_v18, %v783_v16  ;;  %1023 = vmatmul.f32.gmra.mxu2 %v373_v36 }
 0x12c   : > { %896 = vmatmul.f32.gmra.mxu1 %v2369_v9  ;;  %v447_v9 = vld [vmem:[%s1933_s20 + $0xcc] sm:$0xff] }
 0x12e   : > { %v738_v28 = vpop.f32.mrf.mxu2  ;;  %1076 = vmatmul.f32.gmra.mxu3 %v411_v54 }
 0x12f   : > { %v739_v29 = vadd.f32 %v738_v28, %v692_v24  ;;  %v832_v39 = vpop.f32.mrf.mxu0 }
 0x131   : > { %v786_v31 = vadd.f32 %v785_v23, %v739_v29  ;;  %v694_v32 = vpop.f32.mrf.mxu1  ;;  %v791_v42 = vpop.f32.mrf.mxu3 }
 0x132   : > { %v695_v35 = vadd.f32 %v694_v32, %v647_v5  ;;  %1117 = vmatmul.f32.gmra.mxu0 %v445_v33 }
 0x133   : > { %v2569_v37 = vadd.f32 %v832_v39, %v786_v31  ;;  %1026 = vmatmul.f32.gmra.mxu2 %v374_v30 }
 0x134   : > { %899 = vmatmul.f32.gmra.mxu1 %v2424_v27 }
 0x136   : > { %v741_v43 = vpop.f32.mrf.mxu2  ;;  %1123 = vmatmul.f32.vlgmr.msra.gmra.mxu3 %v447_v9 }
 0x137   : > { %v742_v46 = vadd.f32 %v741_v43, %v695_v35  ;;  %v835_v40 = vpop.f32.mrf.mxu0 }
 0x139   : > { %v789_v47 = vadd.f32 %v788_v26, %v742_v46  ;;  %v697_v20 = vpop.f32.mrf.mxu1  ;;  %v794_v49 = vpop.f32.mrf.mxu3 }
 0x13a   : > { %v698_v48 = vadd.f32 %v697_v20, %v650_v41  ;;  %1120 = vmatmul.f32.gmra.mxu0 %v446_v45 }
 0x13b   : > { %v2575_v51 = vadd.f32 %v835_v40, %v789_v47  ;;  %1029 = vmatmul.f32.gmra.mxu2 %v375_v55 }
 0x13c   : > { %902 = vmatmul.f32.gmra.mxu1 %v2465_v44 }
 0x13e   : > { %v744_v7 = vpop.f32.mrf.mxu2 }
 0x13f   : > { %v745_v52 = vadd.f32 %v744_v7, %v698_v48  ;;  %v838_v38 = vpop.f32.mrf.mxu0 }
 0x141   : > { %v792_v27 = vadd.f32 %v791_v42, %v745_v52  ;;  %v700_v53 = vpop.f32.mrf.mxu1  ;;  %v797_v58 = vpop.f32.mrf.mxu3 }
 0x142   : > { %v701_v56 = vadd.f32 %v700_v53, %v2534_v63 }
 0x143   : > { %v2579_v57 = vadd.f32 %v838_v38, %v792_v27 }
 0x146   : > { %v747_v59 = vpop.f32.mrf.mxu2 }
 0x147   : > { %v748_v60 = vadd.f32 %v747_v59, %v701_v56  ;;  %v841_v0 = vpop.f32.mrf.mxu0 }
 0x149   : > { %v795_v62 = vadd.f32 %v794_v49, %v748_v60  ;;  %v703_v1 = vpop.f32.mrf.mxu1  ;;  %v800_v44 = vpop.f32.mrf.mxu3 }
 0x14a   : > { %v704_v3 = vadd.f32 %v703_v1, %v2539_v19 }
 0x14b   : > { %v2582_v34 = vadd.f32 %v841_v0, %v795_v62 }
 0x14e   : > { %v750_v5 = vpop.f32.mrf.mxu2 }
 0x14f   : > { %v751_v6 = vadd.f32 %v750_v5, %v704_v3  ;;  %v844_v11 = vpop.f32.mrf.mxu0 }
 0x151   : > { %v798_v8 = vadd.f32 %v797_v58, %v751_v6  ;;  %v706_v41 = vpop.f32.mrf.mxu1  ;;  %v803_v17 = vpop.f32.mrf.mxu3 }
 0x152   : > { %v707_v63 = vadd.f32 %v706_v41, %v2544_v4 }
 0x153   : > { %v2585_v12 = vadd.f32 %v844_v11, %v798_v8 }
 0x156   : > { %v753_v13 = vpop.f32.mrf.mxu2 }
 0x157   : > { %v754_v23 = vadd.f32 %v753_v13, %v707_v63  ;;  %v847_v14 = vpop.f32.mrf.mxu0 }
 0x159   : > { %v801_v61 = vadd.f32 %v800_v44, %v754_v23  ;;  %v709_v15 = vpop.f32.mrf.mxu1  ;;  %v806_v16 = vpop.f32.mrf.mxu3 }
 0x15a   : > { %v710_v19 = vadd.f32 %v709_v15, %v2551_v2 }
 0x15b   : > { %v2588_v36 = vadd.f32 %v847_v14, %v801_v61 }
 0x15e   : > { %v756_v18 = vpop.f32.mrf.mxu2 }
 0x15f   : > { %v757_v21 = vadd.f32 %v756_v18, %v710_v19  ;;  %v850_v24 = vpop.f32.mrf.mxu0 }
 0x161   : > { %v804_v22 = vadd.f32 %v803_v17, %v757_v21  ;;  %v712_v26 = vpop.f32.mrf.mxu1  ;;  %v809_v4 = vpop.f32.mrf.mxu3 }
 0x162   : > { %v713_v28 = vadd.f32 %v712_v26, %v2546_v50 }
 0x163   : > { %v2590_v54 = vadd.f32 %v850_v24, %v804_v22 }
 0x166   : > { %v759_v29 = vpop.f32.mrf.mxu2 }
 0x167   : > { %v760_v30 = vadd.f32 %v759_v29, %v713_v28  ;;  %v853_v39 = vpop.f32.mrf.mxu0 }
 0x169   : > { %v807_v31 = vadd.f32 %v806_v16, %v760_v30  ;;  %v715_v32 = vpop.f32.mrf.mxu1  ;;  %v1050_v2 = vpop.f32.mrf.mxu3 }
 0x16a   : > { %v716_v35 = vadd.f32 %v715_v32, %v2555_v10  ;;  %v2602_v10 = vld [vmem:[%s2681_s2] ss:$0 sm:$0xff] }
 0x16b   : > { %v2593_v33 = vadd.f32 %v853_v39, %v807_v31 }
 0x16e   : > { %v762_v42 = vpop.f32.mrf.mxu2 }
 0x16f   : > { %v763_v9 = vadd.f32 %v762_v42, %v716_v35  ;;  %v856_v46 = vpop.f32.mrf.mxu0 }
 0x171   : > { %v810_v43 = vadd.f32 %v809_v4, %v763_v9  ;;  %v876_v55 = vpop.f32.mrf.mxu1  ;;  %v1053_v40 = vpop.f32.mrf.mxu3 }
 0x172   : > { %v877_v49 = vadd.f32 %v876_v55, %v2563_v25 }
 0x173   : > { %v2596_v47 = vadd.f32 %v856_v46, %v810_v43 }
 0x176   : > { %v1003_v50 = vpop.f32.mrf.mxu2 }
 0x177   : > { %v1051_v20 = vadd.f32 %v1050_v2, %v1003_v50  ;;  %v1097_v45 = vpop.f32.mrf.mxu0 }
 0x179   : > { %v879_v48 = vpop.f32.mrf.mxu1  ;;  %v1098_v7 = vadd.f32 %v1097_v45, %v1051_v20  ;;  %v1056_v52 = vpop.f32.mrf.mxu3 }
 0x17a   : > { %v880_v60 = vadd.f32 %v879_v48, %v2569_v37 }
 0x17b   : > { %v1127_v27 = vadd.f32 %v1098_v7, %v877_v49 }
 0x17d   : > { %v1141_v38 = vadd.f32 %v2602_v10, %v1127_v27 }
 0x17e   : > { %v1006_v53 = vpop.f32.mrf.mxu2 }
 0x17f   : > { %v1054_v56 = vadd.f32 %v1053_v40, %v1006_v53  ;;  %1151 = vst [vmem:[%s1795_s11] sm:$0xff] %v1141_v38  ;;  %v1100_v58 = vpop.f32.mrf.mxu0 }
 0x181   : > { %v882_v59 = vpop.f32.mrf.mxu1  ;;  %v1101_v62 = vadd.f32 %v1100_v58, %v1054_v56  ;;  %v1059_v25 = vpop.f32.mrf.mxu3 }
 0x182   : > { %v883_v8 = vadd.f32 %v882_v59, %v2575_v51 }
 0x183   : > { %v1128_v0 = vadd.f32 %v1101_v62, %v880_v60 }
 0x185   : > { %v1142_v1 = vadd.f32 %v2602_v10, %v1128_v0 }
 0x186   : > { %v1009_v3 = vpop.f32.mrf.mxu2 }
 0x187   : > { %v1057_v44 = vadd.f32 %v1056_v52, %v1009_v3  ;;  %1152 = vst [vmem:[%s1795_s11 + $0x8] sm:$0xff] %v1142_v1  ;;  %v1103_v5 = vpop.f32.mrf.mxu0 }
 0x189   : > { %v885_v6 = vpop.f32.mrf.mxu1  ;;  %v1104_v11 = vadd.f32 %v1103_v5, %v1057_v44  ;;  %v1062_v41 = vpop.f32.mrf.mxu3 }
 0x18a   : > { %v886_v14 = vadd.f32 %v885_v6, %v2579_v57 }
 0x18b   : > { %v1129_v63 = vadd.f32 %v1104_v11, %v883_v8 }
 0x18d   : > { %v1143_v17 = vadd.f32 %v2602_v10, %v1129_v63 }
 0x18e   : > { %v1012_v37 = vpop.f32.mrf.mxu2 }
 0x18f   : > { %v1060_v13 = vadd.f32 %v1059_v25, %v1012_v37  ;;  %1153 = vst [vmem:[%s1795_s11 + $0x10] sm:$0xff] %v1143_v17  ;;  %v1106_v23 = vpop.f32.mrf.mxu0 }
 0x191   : > { %v888_v61 = vpop.f32.mrf.mxu1  ;;  %v1107_v15 = vadd.f32 %v1106_v23, %v1060_v13  ;;  %v1065_v19 = vpop.f32.mrf.mxu3 }
 0x192   : > { %v889_v26 = vadd.f32 %v888_v61, %v2582_v34 }
 0x193   : > { %v1130_v16 = vadd.f32 %v1107_v15, %v886_v14 }
 0x195   : > { %v1144_v18 = vadd.f32 %v2602_v10, %v1130_v16 }
 0x196   : > { %v1015_v51 = vpop.f32.mrf.mxu2 }
 0x197   : > { %v1063_v21 = vadd.f32 %v1062_v41, %v1015_v51  ;;  %1154 = vst [vmem:[%s1795_s11 + $0x18] sm:$0xff] %v1144_v18  ;;  %v1109_v22 = vpop.f32.mrf.mxu0 }
 0x199   : > { %v891_v24 = vpop.f32.mrf.mxu1  ;;  %v1110_v4 = vadd.f32 %v1109_v22, %v1063_v21  ;;  %v1068_v28 = vpop.f32.mrf.mxu3 }
 0x19a   : > { %v892_v2 = vadd.f32 %v891_v24, %v2585_v12 }
 0x19b   : > { %v1131_v29 = vadd.f32 %v1110_v4, %v889_v26 }
 0x19d   : > { %v1145_v30 = vadd.f32 %v2602_v10, %v1131_v29 }
 0x19e   : > { %v1018_v57 = vpop.f32.mrf.mxu2 }
 0x19f   : > { %v1066_v31 = vadd.f32 %v1065_v19, %v1018_v57  ;;  %1155 = vst [vmem:[%s1795_s11 + $0x20] sm:$0xff] %v1145_v30  ;;  %v1112_v39 = vpop.f32.mrf.mxu0 }
 0x1a1   : > { %v894_v32 = vpop.f32.mrf.mxu1  ;;  %v1113_v35 = vadd.f32 %v1112_v39, %v1066_v31  ;;  %v1071_v42 = vpop.f32.mrf.mxu3 }
 0x1a2   : > { %v895_v50 = vadd.f32 %v894_v32, %v2588_v36 }
 0x1a3   : > { %v1132_v9 = vadd.f32 %v1113_v35, %v892_v2 }
 0x1a5   : > { %v1146_v43 = vadd.f32 %v2602_v10, %v1132_v9 }
 0x1a6   : > { %v1021_v34 = vpop.f32.mrf.mxu2 }
 0x1a7   : > { %v1069_v46 = vadd.f32 %v1068_v28, %v1021_v34  ;;  %1156 = vst [vmem:[%s1795_s11 + $0x28] sm:$0xff] %v1146_v43  ;;  %v1115_v55 = vpop.f32.mrf.mxu0 }
 0x1a9   : > { %v897_v40 = vpop.f32.mrf.mxu1  ;;  %v1116_v20 = vadd.f32 %v1115_v55, %v1069_v46  ;;  %v1074_v45 = vpop.f32.mrf.mxu3 }
 0x1aa   : > { %v898_v27 = vadd.f32 %v897_v40, %v2590_v54 }
 0x1ab   : > { %v1133_v48 = vadd.f32 %v1116_v20, %v895_v50 }
 0x1ad   : > { %v1147_v12 = vadd.f32 %v2602_v10, %v1133_v48 }
 0x1ae   : > { %v1024_v49 = vpop.f32.mrf.mxu2 }
 0x1af   : > { %v1072_v7 = vadd.f32 %v1071_v42, %v1024_v49  ;;  %1157 = vst [vmem:[%s1795_s11 + $0x30] sm:$0xff] %v1147_v12  ;;  %v1118_v52 = vpop.f32.mrf.mxu0 }
 0x1b1   : > { %v1119_v38 = vadd.f32 %v1118_v52, %v1072_v7  ;;  %v900_v53 = vpop.f32.mrf.mxu1  ;;  %v1077_v58 = vpop.f32.mrf.mxu3 }
 0x1b2   : > { %v901_v25 = vadd.f32 %v900_v53, %v2593_v33 }
 0x1b3   : > { %v1134_v56 = vadd.f32 %v1119_v38, %v898_v27 }
 0x1b5   : > { %v1148_v36 = vadd.f32 %v2602_v10, %v1134_v56 }
 0x1b6   : > { %v1027_v59 = vpop.f32.mrf.mxu2 }
 0x1b7   : > { %v1075_v60 = vadd.f32 %v1074_v45, %v1027_v59  ;;  %1158 = vst [vmem:[%s1795_s11 + $0x38] sm:$0xff] %v1148_v36  ;;  %v1121_v62 = vpop.f32.mrf.mxu0 }
 0x1b9   : > { %v1122_v0 = vadd.f32 %v1121_v62, %v1075_v60  ;;  %v903_v1 = vpop.f32.mrf.mxu1  ;;  %v1124_v5 = vpop.f32.mrf.mxu3 }
 0x1ba   : > { %v904_v8 = vadd.f32 %v903_v1, %v2596_v47 }
 0x1bb   : > { %v1135_v54 = vadd.f32 %v1122_v0, %v901_v25 }
 0x1bd   : > { %v1149_v3 = vadd.f32 %v2602_v10, %v1135_v54 }
 0x1be   : > { %v1030_v44 = vpop.f32.mrf.mxu2 }
 0x1bf   : > { %v1078_v6 = vadd.f32 %v1077_v58, %v1030_v44  ;;  %1159 = vst [vmem:[%s1795_s11 + $0x40] sm:$0xff] %v1149_v3 }
 0x1c1   : > { %v1125_v33 = vadd.f32 %v1124_v5, %v1078_v6 }
 0x1c3   : > { %v1136_v11 = vadd.f32 %v1125_v33, %v904_v8 }
 0x1c5   : > { %v1150_v41 = vadd.f32 %v2602_v10, %v1136_v11 }
 0x1c7   : > { %1160 = vst [vmem:[%s1795_s11 + $0x48] sm:$0xff] %v1150_v41 }
 0x1c8   : > { %1623 = shalt.err (!%p1620_p10)
}
 0x1c9   : > { %s1694_s4 = smov 128   ;;  %s1695_s11 = smov 8  }
 0x1ca   : > { %1522 = dma.vmem_to_hbm [thread:$0]  (%p1767_p3), %s1180_s7, 1280, %s1182_s8, %s1162_s21, %s1694_s4, %s1694_s4, %s1695_s11  }
 0x1cb PF: > { %p1528_p11 = scmp.ge.s32.totalorder %s1692_s19, 2  ;;  %s1196_s10 = sand.u32 1, %s1664_s12  }
 0x1cc   : > { %s1197_s15 = scalar_lea.sflag [#allocation6], %s1196_s10 }
 0x1cd   : > { %p1525_p12 = pnand %p1528_p11, %p1776_p8 }
 0x1cf   : > { %p1526_p13 = pneg %p1525_p12 }
 0x1d1   : > { %1659 = dma.done.wait (%p1526_p13), %s1197_s15, 1280  }
 0x1d2   : > { %1661 = vsyncadd (%p1526_p13), %s1197_s15, 4294966016  ;;  %s16_s19 = sadd.s32 1, %s1692_s19   ;;  %s2685_s12 = smov %s1668_s13 }
 0x1d3   : > { %p13_p0 = scmp.ge.s32.totalorder %s16_s19, 10   ;;  %s2686_s13 = smov %s1672_s14 }
 0x1d4   : > { %s2687_s14 = smov %s1785_s30  ;;  %s2688_s15 = smov %s1684_s17 }
 0x1d5   : > { %s2689_s16 = smov %s1688_s18  ;;  %s2690_s17 = smov %s2693_s22 }
 0x1d6   : > { %s2691_s18 = smov %s2697_s23  ;;  %15 = sbr.rel (!%p13_p0) target bundleno = 5 (0x5), region = 145 }
 0x1db   :  { %1203 = vsyncpa [#allocation6], 1 }
 0x1dc   :  { %1205 = vsyncpa [#allocation6 + $0x1], 1 }
 0x1dd   :  { %1206 = vsyncmov [#allocation4] }
 0x1e0   :  { %s1207_s25 = vpop.sfrf %1206 }
 0x1e1   :  { %p1469_p3 = scmp.ne.s32.totalorder %s1207_s25, 0 }
 0x1e3   :  { %1211 = shalt.err (%p1469_p3)  }
 0x1e4   :  { %1213 = vsyncmov [#allocation4 + $0x1] }
 0x1e7   :  { %s1214_s26 = vpop.sfrf %1213 }
 0x1e8   :  { %p1470_p8 = scmp.ne.s32.totalorder %s1214_s26, 0 }
 0x1ea   :  { %1218 = shalt.err (%p1470_p8)  }

</bundles_post_ra>
